<compile_context>
chip_gen: v5e
topology: v5e:2x2
jax: 0.10.0
libtpu: 0.0.40
codegen_flags: <defaults>
</compile_context>

<pallas_src>
import functools
import math

import jax
import jax.numpy as jnp
from jax.experimental import pallas as pl
from jax.experimental.pallas import tpu as pltpu


# ----------------------------- small helpers --------------------------------

def _layer_norm(x, gamma, beta, eps=1e-12):
    # BertLayerNorm: gamma * (x - mean) / sqrt(var + eps) + beta  (eps inside the sqrt).
    u = jnp.mean(x, axis=-1, keepdims=True)
    xc = x - u
    var = jnp.mean(xc * xc, axis=-1, keepdims=True)
    return xc * jax.lax.rsqrt(var + eps) * gamma + beta           # rsqrt -> EUP slot


def _device_kind():
    try:
        return jax.devices()[0].device_kind.lower()
    except Exception:
        return ""


def _vmem_capacity_bytes():
    try:
        cap = int(pltpu.get_tpu_info().vmem_capacity_bytes)
        if cap > 0:
            return cap
    except Exception:
        pass
    kind = _device_kind()
    if "v7" in kind:
        return 64 << 20
    return 128 << 20


def _ffn_act_dtype(compute_dtype):
    # bf16 intermediate (gelu + second FFN matmul input) only where the VPU/EUP have
    # native bf16 (v6e/v7x); keep f32 on older generations.
    kind = _device_kind()
    if any(v in kind for v in ("v2", "v3", "v4", "v5")):
        return jnp.float32
    return compute_dtype


def _pick_q_block(S, vmem_capacity_bytes, return_probs):
    # v7x (64 MiB VMEM per TC): shrink the q tile when the probs block is also resident.
    # v5e/v6e (128 MiB): keep the larger tile to amortize per-grid-step overhead.
    prefer = 128 if (vmem_capacity_bytes <= (64 << 20) and return_probs) else 256
    for cand in (prefer, 256, 128, 64, 32, 16, 8):
        if cand <= S and S % cand == 0:
            return cand
    return S


@functools.lru_cache(maxsize=1)
def _single_buffer_supported():
    """Probe pl.Buffered(1) support with a tiny standalone pallas_call so a probe failure
    can never mask a real failure of the main kernel (no blanket except around it)."""
    def _copy(x_ref, o_ref):
        o_ref[...] = x_ref[...]
    try:
        spec = pl.BlockSpec((8, 128), lambda i: (0, 0), pipeline_mode=pl.Buffered(1))
        fn = pl.pallas_call(
            _copy, grid=(1,),
            in_specs=[spec],
            out_specs=pl.BlockSpec((8, 128), lambda i: (0, 0)),
            out_shape=jax.ShapeDtypeStruct((8, 128), jnp.float32))
        jax.block_until_ready(fn(jnp.zeros((8, 128), jnp.float32)))
        return True
    except Exception:
        return False


# ------------------------------- the kernel ---------------------------------

def bert_layer_kernel(x_ref, mask_ref,
                      wq_ref, bq_ref, wk_ref, bk_ref, wv_ref, bv_ref,
                      wo_ref, bo_ref, g1_ref, b1_ref,
                      wi_ref, bi_ref, wo2_ref, bo2_ref, g2_ref, b2_ref,
                      *rest,
                      num_heads, head_size, q_block, return_probs,
                      compute_dtype, ffn_dtype, approx_recip, gelu_approximate):
    if return_probs:
        out_ref, probs_ref, k_sc, v_sc, ctx_sc = rest
    else:
        out_ref, k_sc, v_sc, ctx_sc = rest
        probs_ref = None

    c = compute_dtype
    Dh = head_size
    S = x_ref.shape[1]
    qi = pl.program_id(1)

    # ---- K/V: ONE full-width (S,H)@(H,H) projection each, cached per batch element ----
    @pl.when(qi == 0)
    def _():
        x_all = x_ref[0].astype(c)                                            # (S, H)
        k_all = (jnp.dot(x_all, wk_ref[...], preferred_element_type=jnp.float32)
                 + bk_ref[...]).astype(c)                                     # (S, H)
        v_all = (jnp.dot(x_all, wv_ref[...], preferred_element_type=jnp.float32)
                 + bv_ref[...]).astype(c)                                     # (S, H)
        for h in range(num_heads):                                            # static loop
            k_sc[h] = k_all[:, h * Dh:(h + 1) * Dh]                           # (S, Dh)
            v_sc[h] = v_all[:, h * Dh:(h + 1) * Dh]                           # (S, Dh)

    # ---- current query tile (also the residual input) ----
    row0 = pl.multiple_of(qi * q_block, q_block)
    xq = x_ref[0, pl.ds(row0, q_block), :]                                    # (tq, H) f32
    xq_c = xq.astype(c)

    # Mask broadcast hoisted out of the head loop (JAX does not CSE broadcast_in_dim).
    mask_b = jnp.broadcast_to(mask_ref[0], (q_block, S))                      # (tq, S) f32

    # ---- Q projection: ONE full-width matmul; 1/sqrt(Dh) folded in once ----
    inv_scale = 1.0 / math.sqrt(Dh)
    q_all = jnp.dot(xq_c, wq_ref[...], preferred_element_type=jnp.float32) + bq_ref[...]
    q_all = (q_all * inv_scale).astype(c)                                     # (tq, H)

    # (tq,Dh) x (S,Dh) -> (tq,S): contract last dims, no explicit K transpose.
    dn = (((1,), (1,)), ((), ()))
    for h in range(num_heads):
        qh = q_all[:, h * Dh:(h + 1) * Dh]                                    # (tq, Dh)
        s = jax.lax.dot_general(qh, k_sc[h], dn,
                                preferred_element_type=jnp.float32) + mask_b  # (tq, S)
        m = jnp.max(s, axis=-1, keepdims=True)
        e = jnp.exp(s - m)
        p = e * pl.reciprocal(jnp.sum(e, axis=-1, keepdims=True), approx=approx_recip)

        if probs_ref is not None:
            probs_ref[0, h] = p.astype(probs_ref.dtype)   # attention dropout = identity (eval)

        ctx = jnp.dot(p.astype(c), v_sc[h], preferred_element_type=jnp.float32)   # (tq, Dh)
        # Head merge: contiguous 64-lane column block of the (tq, H) ctx slab.
        ctx_sc[:, h * Dh:(h + 1) * Dh] = ctx

    # ---- BertSelfOutput: ONE merged (tq,H)@(H,H) output projection + LayerNorm(residual) ----
    attn = jnp.dot(ctx_sc[...].astype(c), wo_ref[...],
                   preferred_element_type=jnp.float32) + bo_ref[...]
    attn = _layer_norm(attn + xq, g1_ref[...], b1_ref[...])

    # ---- BertIntermediate: dense + gelu (tanh form = original BERT gelu; EUP) ----
    h1 = jnp.dot(attn.astype(c), wi_ref[...], preferred_element_type=jnp.float32) + bi_ref[...]
    inter = jax.nn.gelu(h1.astype(ffn_dtype), approximate=gelu_approximate)

    # ---- BertOutput: dense + dropout(identity) + LayerNorm(residual) ----
    out = jnp.dot(inter.astype(c), wo2_ref[...], preferred_element_type=jnp.float32) + bo2_ref[...]
    out = _layer_norm(out + attn, g2_ref[...], b2_ref[...])
    out_ref[0] = out.astype(out_ref.dtype)


# ------------------------------- the wrapper ---------------------------------

def bert_layer(hidden_states, attention_mask, params, *, num_heads,
               q_block=None, compute_dtype=jnp.bfloat16,
               return_probs=True, probs_dtype=jnp.float32,
               gelu_approximate=True):
    """Fused BertLayer forward.  Returns (layer_output, attention_probs_or_None).

    For perf-critical inference, set return_probs=False (removes the B*NH*S*S probs
    writeback) or probs_dtype=jnp.bfloat16; default keeps PyTorch semantics (f32 probs).
    """
    B, S, H = hidden_states.shape
    I = params["wi"].shape[1]
    assert H % num_heads == 0
    Dh = H // num_heads

    c = jnp.dtype(compute_dtype)
    vmem_cap = _vmem_capacity_bytes()
    if q_block is None:
        q_block = _pick_q_block(S, vmem_cap, return_probs)
    assert S % q_block == 0
    n_q = S // q_block

    f32 = lambda a: a.astype(jnp.float32)
    mask3 = attention_mask.reshape(B, 1, S).astype(jnp.float32)    # (B,1,1,S) -> (B,1,S)
    args = (hidden_states, mask3,
            params["wq"].astype(c), f32(params["bq"]),
            params["wk"].astype(c), f32(params["bk"]),
            params["wv"].astype(c), f32(params["bv"]),
            params["wo"].astype(c), f32(params["bo"]),
            f32(params["g1"]), f32(params["b1"]),
            params["wi"].astype(c), f32(params["bi"]),
            params["wo2"].astype(c), f32(params["bo2"]),
            f32(params["g2"]), f32(params["b2"]))

    single_buf = _single_buffer_supported()

    def const_spec(shape):
        idx = lambda b, qi, _n=len(shape): (0,) * _n
        if single_buf:
            # Constant weight blocks never change across the grid -> single-buffer them
            # to halve their VMEM footprint (critical on v7x's 64 MiB VMEM).
            return pl.BlockSpec(shape, idx, pipeline_mode=pl.Buffered(1))
        return pl.BlockSpec(shape, idx)

    in_specs = [
        pl.BlockSpec((1, S, H), lambda b, qi: (b, 0, 0)),          # hidden_states
        pl.BlockSpec((1, 1, S), lambda b, qi: (b, 0, 0)),          # additive attention mask
        const_spec((H, H)), const_spec((1, H)),                    # query dense
        const_spec((H, H)), const_spec((1, H)),                    # key dense
        const_spec((H, H)), const_spec((1, H)),                    # value dense
        const_spec((H, H)), const_spec((1, H)),                    # self-output dense
        const_spec((1, H)), const_spec((1, H)),                    # LayerNorm 1
        const_spec((H, I)), const_spec((1, I)),                    # intermediate dense
        const_spec((I, H)), const_spec((1, H)),                    # output dense
        const_spec((1, H)), const_spec((1, H)),                    # LayerNorm 2
    ]

    out_spec = pl.BlockSpec((1, q_block, H), lambda b, qi: (b, qi, 0))
    out_sds = jax.ShapeDtypeStruct((B, S, H), hidden_states.dtype)
    if return_probs:
        out_specs = (out_spec,
                     pl.BlockSpec((1, num_heads, q_block, S), lambda b, qi: (b, 0, qi, 0)))
        out_shapes = (out_sds, jax.ShapeDtypeStruct((B, num_heads, S, S), probs_dtype))
    else:
        out_specs, out_shapes = out_spec, out_sds

    scratch_shapes = [
        pltpu.VMEM((num_heads, S, Dh), compute_dtype),   # K cache (NH,S,Dh): dot_general contracts last dims
        pltpu.VMEM((num_heads, S, Dh), compute_dtype),   # V cache
        pltpu.VMEM((q_block, H), jnp.float32),           # per-head ctx slab -> one merged Wo matmul
    ]

    # --- VMEM budget, clamped to this chip's capacity ---
    weight_bytes = sum(int(a.size) * a.dtype.itemsize for a in args[2:])
    wbuf = 1 if single_buf else 2
    out_isz = jnp.dtype(hidden_states.dtype).itemsize
    probs_isz = jnp.dtype(probs_dtype).itemsize
    io_block_bytes = 2 * (S * H * 4 + S * 4 + q_block * H * out_isz)
    if return_probs:
        io_block_bytes += 2 * num_heads * q_block * S * probs_isz
    scratch_bytes = 2 * num_heads * S * max(Dh, 128) * c.itemsize + q_block * H * 4
    temp_bytes = 4 * (3 * q_block * S + 2 * q_block * I + 6 * q_block * H + S * H)
    desired = wbuf * weight_bytes + io_block_bytes + scratch_bytes + temp_bytes + (4 << 20)
    vmem_limit = int(min(max(desired, 32 << 20), int(0.9 * vmem_cap)))

    flops = 2 * B * S * (4 * H * H + 2 * H * I) + 4 * B * S * S * H
    transcendentals = B * (num_heads * S * S + S * I)
    bytes_accessed = int(hidden_states.size * hidden_states.dtype.itemsize
                         + B * S * 4 + weight_bytes + B * S * H * out_isz
                         + (B * num_heads * S * S * probs_isz if return_probs else 0))
    cost = pl.CostEstimate(flops=int(flops), transcendentals=int(transcendentals),
                           bytes_accessed=bytes_accessed)

    kernel = functools.partial(
        bert_layer_kernel,
        num_heads=num_heads, head_size=Dh, q_block=q_block,
        return_probs=return_probs, compute_dtype=compute_dtype,
        ffn_dtype=_ffn_act_dtype(compute_dtype),
        approx_recip=not return_probs,            # exact softmax denom when probs are returned
        gelu_approximate=gelu_approximate)

    # TODO(synk): on v7x with B=1 the "parallel" batch axis leaves one TensorCore idle;
    # splitting the qi axis across cores would require per-core K/V (re)projection or a
    # separate K/V pallas_call.
    result = pl.pallas_call(
        kernel,
        grid=(B, n_q),
        in_specs=in_specs,
        out_specs=out_specs,
        out_shape=out_shapes,
        scratch_shapes=scratch_shapes,
        compiler_params=pltpu.CompilerParams(
            dimension_semantics=("parallel", "arbitrary"),
            vmem_limit_bytes=vmem_limit),
        cost_estimate=cost,
    )(*args)

    if return_probs:
        layer_output, attention_probs = result
        return layer_output, attention_probs
    return result, None


# --------------------------- params / reference ------------------------------

def init_params(key, hidden_size, intermediate_size):
    ks = jax.random.split(key, 12)
    H, I = hidden_size, intermediate_size

    def w(k, shape):
        return 0.02 * jax.random.normal(k, shape, jnp.float32)

    # Weights are stored as (in_features, out_features) == torch nn.Linear weight.T
    return dict(
        wq=w(ks[0], (H, H)), bq=w(ks[1], (1, H)),
        wk=w(ks[2], (H, H)), bk=w(ks[3], (1, H)),
        wv=w(ks[4], (H, H)), bv=w(ks[5], (1, H)),
        wo=w(ks[6], (H, H)), bo=w(ks[7], (1, H)),
        g1=jnp.ones((1, H), jnp.float32), b1=jnp.zeros((1, H), jnp.float32),
        wi=w(ks[8], (H, I)), bi=w(ks[9], (1, I)),
        wo2=w(ks[10], (I, H)), bo2=w(ks[11], (1, H)),
        g2=jnp.ones((1, H), jnp.float32), b2=jnp.zeros((1, H), jnp.float32),
    )


def bert_layer_reference(hidden_states, attention_mask, params, *, num_heads):
    """Pure-JAX f32 reference matching the PyTorch module (eval mode, tanh gelu)."""
    B, S, H = hidden_states.shape
    Dh = H // num_heads
    x = hidden_states.astype(jnp.float32)

    def dense(v, w, b):
        return jnp.einsum("bsh,hd->bsd", v, w) + b

    def heads(t):
        return t.reshape(B, S, num_heads, Dh).transpose(0, 2, 1, 3)

    q, k, v = heads(dense(x, params["wq"], params["bq"])), \
              heads(dense(x, params["wk"], params["bk"])), \
              heads(dense(x, params["wv"], params["bv"]))
    scores = jnp.einsum("bhqd,bhkd->bhqk", q, k) / math.sqrt(Dh) + attention_mask
    probs = jax.nn.softmax(scores, axis=-1)
    ctx = jnp.einsum("bhqk,bhkd->bhqd", probs, v).transpose(0, 2, 1, 3).reshape(B, S, H)

    def ln(y, g, b, eps=1e-12):
        u = y.mean(-1, keepdims=True)
        var = ((y - u) ** 2).mean(-1, keepdims=True)
        return (y - u) / jnp.sqrt(var + eps) * g + b

    attn_out = ln(dense(ctx, params["wo"], params["bo"]) + x, params["g1"], params["b1"])
    inter = jax.nn.gelu(dense(attn_out, params["wi"], params["bi"]), approximate=True)
    out = ln(dense(inter, params["wo2"], params["bo2"]) + attn_out, params["g2"], params["b2"])
    return out, probs


# ---------------------------------- demo -------------------------------------

if __name__ == "__main__":
    B, S, H, NUM_HEADS, INTER = 2, 8, 32, 4, 64

    key = jax.random.PRNGKey(0)
    k_hidden, k_params = jax.random.split(key)

    hidden_states = jax.random.normal(k_hidden, (B, S, H), jnp.float32)

    # BERT-style additive mask: batch 0 attends everywhere, batch 1 masks last 2 tokens.
    pad = jnp.array([[1.0] * S, [1.0] * (S - 2) + [0.0, 0.0]], jnp.float32)
    attention_mask = (1.0 - pad)[:, None, None, :] * -10000.0          # (B,1,1,S)

    params = init_params(k_params, H, INTER)

    layer_output, attn_probs = bert_layer(hidden_states, attention_mask, params,
                                          num_heads=NUM_HEADS)
    jax.block_until_ready(layer_output)
    jax.block_until_ready(attn_probs)

    assert layer_output.shape == (B, S, H)
    assert attn_probs.shape == (B, NUM_HEADS, S, S)
    assert bool(jnp.all(jnp.isfinite(layer_output)))
    assert bool(jnp.allclose(jnp.sum(attn_probs, axis=-1), 1.0, atol=1e-2))

    # Compare against a pure-JAX f32 reference (bf16 compute -> loose tolerances).
    ref_out, ref_probs = bert_layer_reference(hidden_states, attention_mask, params,
                                              num_heads=NUM_HEADS)
    assert bool(jnp.allclose(attn_probs, ref_probs.astype(attn_probs.dtype), atol=5e-2))
    assert bool(jnp.allclose(layer_output, ref_out.astype(layer_output.dtype), atol=1.5e-1))
    print("KERNEL_OK")
</pallas_src>

<mosaic_0001>
module attributes {stable_mosaic.version = 11 : i64} {
  func.func @_copy(%arg0: i32, %arg1: memref<8x128xf32, #tpu.memory_space<vmem>>, %arg2: memref<8x128xf32, #tpu.memory_space<vmem>>) attributes {dimension_semantics = [#tpu.dimension_semantics<arbitrary>], iteration_bounds = array<i64: 1>, scalar_prefetch = 0 : i64, scratch_operands = 0 : i64, tpu.core_type = #tpu.core_type<tc>, window_params = [{pipeline_mode = #tpu.pipeline_mode<synchronous>, transform_indices = @transform_0, window_bounds = array<i64: 8, 128>}, {pipeline_mode = #tpu.pipeline_mode<synchronous>, transform_indices = @transform_1, window_bounds = array<i64: 8, 128>}]} {
    %c0 = arith.constant 0 : index
    %c0_0 = arith.constant 0 : index
    %0 = vector.load %arg1[%c0, %c0_0] : memref<8x128xf32, #tpu.memory_space<vmem>>, vector<8x128xf32>
    %c0_1 = arith.constant 0 : index
    %c0_2 = arith.constant 0 : index
    %1 = vector.load %arg2[%c0_1, %c0_2] : memref<8x128xf32, #tpu.memory_space<vmem>>, vector<8x128xf32>
    tpu.vector_store %arg2[%c0_1, %c0_2], %0 {strides = array<i32>} : memref<8x128xf32, #tpu.memory_space<vmem>>, vector<8x128xf32>,
    return
  }
  func.func @transform_0(%arg0: i32) -> (i32, i32) {
    %c0_i32 = arith.constant 0 : i32
    %c0_i32_0 = arith.constant 0 : i32
    %c0_i32_1 = arith.constant 0 : i32
    return %c0_i32, %c0_i32_0 : i32, i32
  }
  func.func @transform_1(%arg0: i32) -> (i32, i32) {
    %c0_i32 = arith.constant 0 : i32
    %c0_i32_0 = arith.constant 0 : i32
    %c0_i32_1 = arith.constant 0 : i32
    return %c0_i32, %c0_i32_0 : i32, i32
  }
}

module attributes {stable_mosaic.version = 11 : i64} {
  func.func @bert_layer_kernel(%arg0: i32, %arg1: i32, %arg2: memref<1x8x32xf32, #tpu.memory_space<vmem>>, %arg3: memref<1x1x8xf32, #tpu.memory_space<vmem>>, %arg4: memref<32x32xbf16, #tpu.memory_space<vmem>>, %arg5: memref<1x32xf32, #tpu.memory_space<vmem>>, %arg6: memref<32x32xbf16, #tpu.memory_space<vmem>>, %arg7: memref<1x32xf32, #tpu.memory_space<vmem>>, %arg8: memref<32x32xbf16, #tpu.memory_space<vmem>>, %arg9: memref<1x32xf32, #tpu.memory_space<vmem>>, %arg10: memref<32x32xbf16, #tpu.memory_space<vmem>>, %arg11: memref<1x32xf32, #tpu.memory_space<vmem>>, %arg12: memref<1x32xf32, #tpu.memory_space<vmem>>, %arg13: memref<1x32xf32, #tpu.memory_space<vmem>>, %arg14: memref<32x64xbf16, #tpu.memory_space<vmem>>, %arg15: memref<1x64xf32, #tpu.memory_space<vmem>>, %arg16: memref<64x32xbf16, #tpu.memory_space<vmem>>, %arg17: memref<1x32xf32, #tpu.memory_space<vmem>>, %arg18: memref<1x32xf32, #tpu.memory_space<vmem>>, %arg19: memref<1x32xf32, #tpu.memory_space<vmem>>, %arg20: memref<1x8x32xf32, #tpu.memory_space<vmem>>, %arg21: memref<1x4x8x8xf32, #tpu.memory_space<vmem>>, %arg22: memref<4x8x8xbf16, #tpu.memory_space<vmem>>, %arg23: memref<4x8x8xbf16, #tpu.memory_space<vmem>>, %arg24: memref<8x32xf32, #tpu.memory_space<vmem>>) attributes {dimension_semantics = [#tpu.dimension_semantics<parallel>, #tpu.dimension_semantics<arbitrary>], iteration_bounds = array<i64: 2, 1>, scalar_prefetch = 0 : i64, scratch_operands = 3 : i64, tpu.core_type = #tpu.core_type<tc>, window_params = [{transform_indices = @transform_0, window_bounds = array<i64: 1, 8, 32>}, {transform_indices = @transform_1, window_bounds = array<i64: 1, 1, 8>}, {pipeline_mode = #tpu.pipeline_mode<synchronous>, transform_indices = @transform_2, window_bounds = array<i64: 32, 32>}, {pipeline_mode = #tpu.pipeline_mode<synchronous>, transform_indices = @transform_3, window_bounds = array<i64: 1, 32>}, {pipeline_mode = #tpu.pipeline_mode<synchronous>, transform_indices = @transform_4, window_bounds = array<i64: 32, 32>}, {pipeline_mode = #tpu.pipeline_mode<synchronous>, transform_indices = @transform_5, window_bounds = array<i64: 1, 32>}, {pipeline_mode = #tpu.pipeline_mode<synchronous>, transform_indices = @transform_6, window_bounds = array<i64: 32, 32>}, {pipeline_mode = #tpu.pipeline_mode<synchronous>, transform_indices = @transform_7, window_bounds = array<i64: 1, 32>}, {pipeline_mode = #tpu.pipeline_mode<synchronous>, transform_indices = @transform_8, window_bounds = array<i64: 32, 32>}, {pipeline_mode = #tpu.pipeline_mode<synchronous>, transform_indices = @transform_9, window_bounds = array<i64: 1, 32>}, {pipeline_mode = #tpu.pipeline_mode<synchronous>, transform_indices = @transform_10, window_bounds = array<i64: 1, 32>}, {pipeline_mode = #tpu.pipeline_mode<synchronous>, transform_indices = @transform_11, window_bounds = array<i64: 1, 32>}, {pipeline_mode = #tpu.pipeline_mode<synchronous>, transform_indices = @transform_12, window_bounds = array<i64: 32, 64>}, {pipeline_mode = #tpu.pipeline_mode<synchronous>, transform_indices = @transform_13, window_bounds = array<i64: 1, 64>}, {pipeline_mode = #tpu.pipeline_mode<synchronous>, transform_indices = @transform_14, window_bounds = array<i64: 64, 32>}, {pipeline_mode = #tpu.pipeline_mode<synchronous>, transform_indices = @transform_15, window_bounds = array<i64: 1, 32>}, {pipeline_mode = #tpu.pipeline_mode<synchronous>, transform_indices = @transform_16, window_bounds = array<i64: 1, 32>}, {pipeline_mode = #tpu.pipeline_mode<synchronous>, transform_indices = @transform_17, window_bounds = array<i64: 1, 32>}, {transform_indices = @transform_18, window_bounds = array<i64: 1, 8, 32>}, {transform_indices = @transform_19, window_bounds = array<i64: 1, 4, 8, 8>}]} {
    %c0_i32 = arith.constant 0 : i32
    %0 = arith.cmpi eq, %arg1, %c0_i32 : i32
    %1 = arith.extui %0 : i1 to i32
    %c0_i32_0 = arith.constant 0 : i32
    %2 = arith.cmpi ne, %1, %c0_i32_0 : i32
    scf.if %2 {
      %c0_110 = arith.constant 0 : index
      %c0_111 = arith.constant 0 : index
      %c0_112 = arith.constant 0 : index
      %194 = vector.load %arg2[%c0_110, %c0_111, %c0_112] : memref<1x8x32xf32, #tpu.memory_space<vmem>>, vector<1x8x32xf32>
      %195 = vector.shape_cast %194 : vector<1x8x32xf32> to vector<8x32xf32>
      %196 = arith.truncf %195 : vector<8x32xf32> to vector<8x32xbf16>
      %c0_113 = arith.constant 0 : index
      %c0_114 = arith.constant 0 : index
      %197 = vector.load %arg6[%c0_113, %c0_114] : memref<32x32xbf16, #tpu.memory_space<vmem>>, vector<32x32xbf16>
      %cst_115 = arith.constant dense<0.000000e+00> : vector<8x32xf32>
      %198 = tpu.matmul %196, %197, %cst_115 {dimension_numbers = #tpu.dot_dimension_numbers<[1], [0], [0], [1], [0, 0, 1, 1], [], []>} : vector<8x32xbf16>, vector<32x32xbf16>, vector<8x32xf32> -> vector<8x32xf32>
      %c0_116 = arith.constant 0 : index
      %c0_117 = arith.constant 0 : index
      %199 = vector.load %arg7[%c0_116, %c0_117] : memref<1x32xf32, #tpu.memory_space<vmem>>, vector<1x32xf32>
      %200 = vector.broadcast %199 : vector<1x32xf32> to vector<8x32xf32>
      %201 = arith.addf %198, %200 : vector<8x32xf32>
      %202 = arith.truncf %201 : vector<8x32xf32> to vector<8x32xbf16>
      %c0_118 = arith.constant 0 : index
      %c0_119 = arith.constant 0 : index
      %203 = vector.load %arg8[%c0_118, %c0_119] : memref<32x32xbf16, #tpu.memory_space<vmem>>, vector<32x32xbf16>
      %cst_120 = arith.constant dense<0.000000e+00> : vector<8x32xf32>
      %204 = tpu.matmul %196, %203, %cst_120 {dimension_numbers = #tpu.dot_dimension_numbers<[1], [0], [0], [1], [0, 0, 1, 1], [], []>} : vector<8x32xbf16>, vector<32x32xbf16>, vector<8x32xf32> -> vector<8x32xf32>
      %c0_121 = arith.constant 0 : index
      %c0_122 = arith.constant 0 : index
      %205 = vector.load %arg9[%c0_121, %c0_122] : memref<1x32xf32, #tpu.memory_space<vmem>>, vector<1x32xf32>
      %206 = vector.broadcast %205 : vector<1x32xf32> to vector<8x32xf32>
      %207 = arith.addf %204, %206 : vector<8x32xf32>
      %208 = arith.truncf %207 : vector<8x32xf32> to vector<8x32xbf16>
      %209 = vector.extract_strided_slice %202 {offsets = [0, 0], sizes = [8, 8], strides = [1, 1]} : vector<8x32xbf16> to vector<8x8xbf16>
      %c0_123 = arith.constant 0 : index
      %c0_124 = arith.constant 0 : index
      %c0_125 = arith.constant 0 : index
      %210 = vector.load %arg22[%c0_123, %c0_124, %c0_125] : memref<4x8x8xbf16, #tpu.memory_space<vmem>>, vector<1x8x8xbf16>
      %211 = vector.shape_cast %210 : vector<1x8x8xbf16> to vector<8x8xbf16>
      %212 = vector.shape_cast %209 : vector<8x8xbf16> to vector<1x8x8xbf16>
      tpu.vector_store %arg22[%c0_123, %c0_124, %c0_125], %212 {strides = array<i32>} : memref<4x8x8xbf16, #tpu.memory_space<vmem>>, vector<1x8x8xbf16>,
      %213 = vector.extract_strided_slice %208 {offsets = [0, 0], sizes = [8, 8], strides = [1, 1]} : vector<8x32xbf16> to vector<8x8xbf16>
      %c0_126 = arith.constant 0 : index
      %c0_127 = arith.constant 0 : index
      %c0_128 = arith.constant 0 : index
      %214 = vector.load %arg23[%c0_126, %c0_127, %c0_128] : memref<4x8x8xbf16, #tpu.memory_space<vmem>>, vector<1x8x8xbf16>
      %215 = vector.shape_cast %214 : vector<1x8x8xbf16> to vector<8x8xbf16>
      %216 = vector.shape_cast %213 : vector<8x8xbf16> to vector<1x8x8xbf16>
      tpu.vector_store %arg23[%c0_126, %c0_127, %c0_128], %216 {strides = array<i32>} : memref<4x8x8xbf16, #tpu.memory_space<vmem>>, vector<1x8x8xbf16>,
      %217 = vector.extract_strided_slice %202 {offsets = [0, 8], sizes = [8, 8], strides = [1, 1]} : vector<8x32xbf16> to vector<8x8xbf16>
      %c1_129 = arith.constant 1 : index
      %c0_130 = arith.constant 0 : index
      %c0_131 = arith.constant 0 : index
      %218 = vector.load %arg22[%c1_129, %c0_130, %c0_131] : memref<4x8x8xbf16, #tpu.memory_space<vmem>>, vector<1x8x8xbf16>
      %219 = vector.shape_cast %218 : vector<1x8x8xbf16> to vector<8x8xbf16>
      %220 = vector.shape_cast %217 : vector<8x8xbf16> to vector<1x8x8xbf16>
      tpu.vector_store %arg22[%c1_129, %c0_130, %c0_131], %220 {strides = array<i32>} : memref<4x8x8xbf16, #tpu.memory_space<vmem>>, vector<1x8x8xbf16>,
      %221 = vector.extract_strided_slice %208 {offsets = [0, 8], sizes = [8, 8], strides = [1, 1]} : vector<8x32xbf16> to vector<8x8xbf16>
      %c1_132 = arith.constant 1 : index
      %c0_133 = arith.constant 0 : index
      %c0_134 = arith.constant 0 : index
      %222 = vector.load %arg23[%c1_132, %c0_133, %c0_134] : memref<4x8x8xbf16, #tpu.memory_space<vmem>>, vector<1x8x8xbf16>
      %223 = vector.shape_cast %222 : vector<1x8x8xbf16> to vector<8x8xbf16>
      %224 = vector.shape_cast %221 : vector<8x8xbf16> to vector<1x8x8xbf16>
      tpu.vector_store %arg23[%c1_132, %c0_133, %c0_134], %224 {strides = array<i32>} : memref<4x8x8xbf16, #tpu.memory_space<vmem>>, vector<1x8x8xbf16>,
      %225 = vector.extract_strided_slice %202 {offsets = [0, 16], sizes = [8, 8], strides = [1, 1]} : vector<8x32xbf16> to vector<8x8xbf16>
      %c2_135 = arith.constant 2 : index
      %c0_136 = arith.constant 0 : index
      %c0_137 = arith.constant 0 : index
      %226 = vector.load %arg22[%c2_135, %c0_136, %c0_137] : memref<4x8x8xbf16, #tpu.memory_space<vmem>>, vector<1x8x8xbf16>
      %227 = vector.shape_cast %226 : vector<1x8x8xbf16> to vector<8x8xbf16>
      %228 = vector.shape_cast %225 : vector<8x8xbf16> to vector<1x8x8xbf16>
      tpu.vector_store %arg22[%c2_135, %c0_136, %c0_137], %228 {strides = array<i32>} : memref<4x8x8xbf16, #tpu.memory_space<vmem>>, vector<1x8x8xbf16>,
      %229 = vector.extract_strided_slice %208 {offsets = [0, 16], sizes = [8, 8], strides = [1, 1]} : vector<8x32xbf16> to vector<8x8xbf16>
      %c2_138 = arith.constant 2 : index
      %c0_139 = arith.constant 0 : index
      %c0_140 = arith.constant 0 : index
      %230 = vector.load %arg23[%c2_138, %c0_139, %c0_140] : memref<4x8x8xbf16, #tpu.memory_space<vmem>>, vector<1x8x8xbf16>
      %231 = vector.shape_cast %230 : vector<1x8x8xbf16> to vector<8x8xbf16>
      %232 = vector.shape_cast %229 : vector<8x8xbf16> to vector<1x8x8xbf16>
      tpu.vector_store %arg23[%c2_138, %c0_139, %c0_140], %232 {strides = array<i32>} : memref<4x8x8xbf16, #tpu.memory_space<vmem>>, vector<1x8x8xbf16>,
      %233 = vector.extract_strided_slice %202 {offsets = [0, 24], sizes = [8, 8], strides = [1, 1]} : vector<8x32xbf16> to vector<8x8xbf16>
      %c3_141 = arith.constant 3 : index
      %c0_142 = arith.constant 0 : index
      %c0_143 = arith.constant 0 : index
      %234 = vector.load %arg22[%c3_141, %c0_142, %c0_143] : memref<4x8x8xbf16, #tpu.memory_space<vmem>>, vector<1x8x8xbf16>
      %235 = vector.shape_cast %234 : vector<1x8x8xbf16> to vector<8x8xbf16>
      %236 = vector.shape_cast %233 : vector<8x8xbf16> to vector<1x8x8xbf16>
      tpu.vector_store %arg22[%c3_141, %c0_142, %c0_143], %236 {strides = array<i32>} : memref<4x8x8xbf16, #tpu.memory_space<vmem>>, vector<1x8x8xbf16>,
      %237 = vector.extract_strided_slice %208 {offsets = [0, 24], sizes = [8, 8], strides = [1, 1]} : vector<8x32xbf16> to vector<8x8xbf16>
      %c3_144 = arith.constant 3 : index
      %c0_145 = arith.constant 0 : index
      %c0_146 = arith.constant 0 : index
      %238 = vector.load %arg23[%c3_144, %c0_145, %c0_146] : memref<4x8x8xbf16, #tpu.memory_space<vmem>>, vector<1x8x8xbf16>
      %239 = vector.shape_cast %238 : vector<1x8x8xbf16> to vector<8x8xbf16>
      %240 = vector.shape_cast %237 : vector<8x8xbf16> to vector<1x8x8xbf16>
      tpu.vector_store %arg23[%c3_144, %c0_145, %c0_146], %240 {strides = array<i32>} : memref<4x8x8xbf16, #tpu.memory_space<vmem>>, vector<1x8x8xbf16>,
    } else {
    }
    %c8_i32 = arith.constant 8 : i32
    %3 = arith.muli %arg1, %c8_i32 : i32
    %4 = tpu.assume_multiple %3, 8 : i32
    %c0 = arith.constant 0 : index
    %5 = arith.index_cast %4 : i32 to index
    %c0_1 = arith.constant 0 : index
    %6 = vector.load %arg2[%c0, %5, %c0_1] : memref<1x8x32xf32, #tpu.memory_space<vmem>>, vector<1x8x32xf32>
    %7 = vector.shape_cast %6 : vector<1x8x32xf32> to vector<8x32xf32>
    %8 = arith.truncf %7 : vector<8x32xf32> to vector<8x32xbf16>
    %c0_2 = arith.constant 0 : index
    %c0_3 = arith.constant 0 : index
    %c0_4 = arith.constant 0 : index
    %9 = vector.load %arg3[%c0_2, %c0_3, %c0_4] : memref<1x1x8xf32, #tpu.memory_space<vmem>>, vector<1x1x8xf32>
    %10 = vector.shape_cast %9 : vector<1x1x8xf32> to vector<1x8xf32>
    %11 = vector.shape_cast %10 : vector<1x8xf32> to vector<1x8xf32>
    %12 = vector.broadcast %11 : vector<1x8xf32> to vector<8x8xf32>
    %c0_5 = arith.constant 0 : index
    %c0_6 = arith.constant 0 : index
    %13 = vector.load %arg4[%c0_5, %c0_6] : memref<32x32xbf16, #tpu.memory_space<vmem>>, vector<32x32xbf16>
    %cst = arith.constant dense<0.000000e+00> : vector<8x32xf32>
    %14 = tpu.matmul %8, %13, %cst {dimension_numbers = #tpu.dot_dimension_numbers<[1], [0], [0], [1], [0, 0, 1, 1], [], []>} : vector<8x32xbf16>, vector<32x32xbf16>, vector<8x32xf32> -> vector<8x32xf32>
    %c0_7 = arith.constant 0 : index
    %c0_8 = arith.constant 0 : index
    %15 = vector.load %arg5[%c0_7, %c0_8] : memref<1x32xf32, #tpu.memory_space<vmem>>, vector<1x32xf32>
    %16 = vector.broadcast %15 : vector<1x32xf32> to vector<8x32xf32>
    %17 = arith.addf %14, %16 : vector<8x32xf32>
    %cst_9 = arith.constant 0.353553385 : f32
    %18 = vector.broadcast %cst_9 : f32 to vector<8x32xf32>
    %19 = arith.mulf %17, %18 : vector<8x32xf32>
    %20 = arith.truncf %19 : vector<8x32xf32> to vector<8x32xbf16>
    %21 = vector.extract_strided_slice %20 {offsets = [0, 0], sizes = [8, 8], strides = [1, 1]} : vector<8x32xbf16> to vector<8x8xbf16>
    %c0_10 = arith.constant 0 : index
    %c0_11 = arith.constant 0 : index
    %c0_12 = arith.constant 0 : index
    %22 = vector.load %arg22[%c0_10, %c0_11, %c0_12] : memref<4x8x8xbf16, #tpu.memory_space<vmem>>, vector<1x8x8xbf16>
    %23 = vector.shape_cast %22 : vector<1x8x8xbf16> to vector<8x8xbf16>
    %cst_13 = arith.constant dense<0.000000e+00> : vector<8x8xf32>
    %24 = tpu.matmul %21, %23, %cst_13 {dimension_numbers = #tpu.dot_dimension_numbers<[1], [1], [0], [0], [0, 0, 1, 0], [], []>} : vector<8x8xbf16>, vector<8x8xbf16>, vector<8x8xf32> -> vector<8x8xf32>
    %25 = arith.addf %24, %12 : vector<8x8xf32>
    %cst_14 = arith.constant dense<0xFF800000> : vector<8xf32>
    %26 = vector.multi_reduction <maximumf>, %25, %cst_14 [1] : vector<8x8xf32> to vector<8xf32>
    %27 = vector.shape_cast %26 : vector<8xf32> to vector<8x1xf32>
    %28 = vector.broadcast %27 : vector<8x1xf32> to vector<8x8xf32>
    %29 = arith.subf %25, %28 : vector<8x8xf32>
    %30 = math.exp %29 : vector<8x8xf32>
    %cst_15 = arith.constant dense<0.000000e+00> : vector<8xf32>
    %31 = vector.multi_reduction <add>, %30, %cst_15 [1] : vector<8x8xf32> to vector<8xf32>
    %32 = vector.shape_cast %31 : vector<8xf32> to vector<8x1xf32>
    %33 = tpu.reciprocal %32 : vector<8x1xf32> -> vector<8x1xf32>
    %34 = vector.broadcast %33 : vector<8x1xf32> to vector<8x8xf32>
    %35 = arith.mulf %30, %34 : vector<8x8xf32>
    %c0_16 = arith.constant 0 : index
    %c0_17 = arith.constant 0 : index
    %c0_18 = arith.constant 0 : index
    %c0_19 = arith.constant 0 : index
    %36 = vector.load %arg21[%c0_16, %c0_17, %c0_18, %c0_19] : memref<1x4x8x8xf32, #tpu.memory_space<vmem>>, vector<1x1x8x8xf32>
    %37 = vector.shape_cast %36 : vector<1x1x8x8xf32> to vector<8x8xf32>
    %38 = vector.shape_cast %35 : vector<8x8xf32> to vector<1x1x8x8xf32>
    tpu.vector_store %arg21[%c0_16, %c0_17, %c0_18, %c0_19], %38 {strides = array<i32>} : memref<1x4x8x8xf32, #tpu.memory_space<vmem>>, vector<1x1x8x8xf32>,
    %39 = arith.truncf %35 : vector<8x8xf32> to vector<8x8xbf16>
    %c0_20 = arith.constant 0 : index
    %c0_21 = arith.constant 0 : index
    %c0_22 = arith.constant 0 : index
    %40 = vector.load %arg23[%c0_20, %c0_21, %c0_22] : memref<4x8x8xbf16, #tpu.memory_space<vmem>>, vector<1x8x8xbf16>
    %41 = vector.shape_cast %40 : vector<1x8x8xbf16> to vector<8x8xbf16>
    %cst_23 = arith.constant dense<0.000000e+00> : vector<8x8xf32>
    %42 = tpu.matmul %39, %41, %cst_23 {dimension_numbers = #tpu.dot_dimension_numbers<[1], [0], [0], [1], [0, 0, 1, 1], [], []>} : vector<8x8xbf16>, vector<8x8xbf16>, vector<8x8xf32> -> vector<8x8xf32>
    %c0_24 = arith.constant 0 : index
    %c0_25 = arith.constant 0 : index
    %43 = vector.load %arg24[%c0_24, %c0_25] : memref<8x32xf32, #tpu.memory_space<vmem>>, vector<8x8xf32>
    tpu.vector_store %arg24[%c0_24, %c0_25], %42 {strides = array<i32>} : memref<8x32xf32, #tpu.memory_space<vmem>>, vector<8x8xf32>,
    %44 = vector.extract_strided_slice %20 {offsets = [0, 8], sizes = [8, 8], strides = [1, 1]} : vector<8x32xbf16> to vector<8x8xbf16>
    %c1 = arith.constant 1 : index
    %c0_26 = arith.constant 0 : index
    %c0_27 = arith.constant 0 : index
    %45 = vector.load %arg22[%c1, %c0_26, %c0_27] : memref<4x8x8xbf16, #tpu.memory_space<vmem>>, vector<1x8x8xbf16>
    %46 = vector.shape_cast %45 : vector<1x8x8xbf16> to vector<8x8xbf16>
    %cst_28 = arith.constant dense<0.000000e+00> : vector<8x8xf32>
    %47 = tpu.matmul %44, %46, %cst_28 {dimension_numbers = #tpu.dot_dimension_numbers<[1], [1], [0], [0], [0, 0, 1, 0], [], []>} : vector<8x8xbf16>, vector<8x8xbf16>, vector<8x8xf32> -> vector<8x8xf32>
    %48 = arith.addf %47, %12 : vector<8x8xf32>
    %cst_29 = arith.constant dense<0xFF800000> : vector<8xf32>
    %49 = vector.multi_reduction <maximumf>, %48, %cst_29 [1] : vector<8x8xf32> to vector<8xf32>
    %50 = vector.shape_cast %49 : vector<8xf32> to vector<8x1xf32>
    %51 = vector.broadcast %50 : vector<8x1xf32> to vector<8x8xf32>
    %52 = arith.subf %48, %51 : vector<8x8xf32>
    %53 = math.exp %52 : vector<8x8xf32>
    %cst_30 = arith.constant dense<0.000000e+00> : vector<8xf32>
    %54 = vector.multi_reduction <add>, %53, %cst_30 [1] : vector<8x8xf32> to vector<8xf32>
    %55 = vector.shape_cast %54 : vector<8xf32> to vector<8x1xf32>
    %56 = tpu.reciprocal %55 : vector<8x1xf32> -> vector<8x1xf32>
    %57 = vector.broadcast %56 : vector<8x1xf32> to vector<8x8xf32>
    %58 = arith.mulf %53, %57 : vector<8x8xf32>
    %c0_31 = arith.constant 0 : index
    %c1_32 = arith.constant 1 : index
    %c0_33 = arith.constant 0 : index
    %c0_34 = arith.constant 0 : index
    %59 = vector.load %arg21[%c0_31, %c1_32, %c0_33, %c0_34] : memref<1x4x8x8xf32, #tpu.memory_space<vmem>>, vector<1x1x8x8xf32>
    %60 = vector.shape_cast %59 : vector<1x1x8x8xf32> to vector<8x8xf32>
    %61 = vector.shape_cast %58 : vector<8x8xf32> to vector<1x1x8x8xf32>
    tpu.vector_store %arg21[%c0_31, %c1_32, %c0_33, %c0_34], %61 {strides = array<i32>} : memref<1x4x8x8xf32, #tpu.memory_space<vmem>>, vector<1x1x8x8xf32>,
    %62 = arith.truncf %58 : vector<8x8xf32> to vector<8x8xbf16>
    %c1_35 = arith.constant 1 : index
    %c0_36 = arith.constant 0 : index
    %c0_37 = arith.constant 0 : index
    %63 = vector.load %arg23[%c1_35, %c0_36, %c0_37] : memref<4x8x8xbf16, #tpu.memory_space<vmem>>, vector<1x8x8xbf16>
    %64 = vector.shape_cast %63 : vector<1x8x8xbf16> to vector<8x8xbf16>
    %cst_38 = arith.constant dense<0.000000e+00> : vector<8x8xf32>
    %65 = tpu.matmul %62, %64, %cst_38 {dimension_numbers = #tpu.dot_dimension_numbers<[1], [0], [0], [1], [0, 0, 1, 1], [], []>} : vector<8x8xbf16>, vector<8x8xbf16>, vector<8x8xf32> -> vector<8x8xf32>
    %c0_39 = arith.constant 0 : index
    %c8 = arith.constant 8 : index
    %66 = vector.load %arg24[%c0_39, %c8] : memref<8x32xf32, #tpu.memory_space<vmem>>, vector<8x8xf32>
    tpu.vector_store %arg24[%c0_39, %c8], %65 {strides = array<i32>} : memref<8x32xf32, #tpu.memory_space<vmem>>, vector<8x8xf32>,
    %67 = vector.extract_strided_slice %20 {offsets = [0, 16], sizes = [8, 8], strides = [1, 1]} : vector<8x32xbf16> to vector<8x8xbf16>
    %c2 = arith.constant 2 : index
    %c0_40 = arith.constant 0 : index
    %c0_41 = arith.constant 0 : index
    %68 = vector.load %arg22[%c2, %c0_40, %c0_41] : memref<4x8x8xbf16, #tpu.memory_space<vmem>>, vector<1x8x8xbf16>
    %69 = vector.shape_cast %68 : vector<1x8x8xbf16> to vector<8x8xbf16>
    %cst_42 = arith.constant dense<0.000000e+00> : vector<8x8xf32>
    %70 = tpu.matmul %67, %69, %cst_42 {dimension_numbers = #tpu.dot_dimension_numbers<[1], [1], [0], [0], [0, 0, 1, 0], [], []>} : vector<8x8xbf16>, vector<8x8xbf16>, vector<8x8xf32> -> vector<8x8xf32>
    %71 = arith.addf %70, %12 : vector<8x8xf32>
    %cst_43 = arith.constant dense<0xFF800000> : vector<8xf32>
    %72 = vector.multi_reduction <maximumf>, %71, %cst_43 [1] : vector<8x8xf32> to vector<8xf32>
    %73 = vector.shape_cast %72 : vector<8xf32> to vector<8x1xf32>
    %74 = vector.broadcast %73 : vector<8x1xf32> to vector<8x8xf32>
    %75 = arith.subf %71, %74 : vector<8x8xf32>
    %76 = math.exp %75 : vector<8x8xf32>
    %cst_44 = arith.constant dense<0.000000e+00> : vector<8xf32>
    %77 = vector.multi_reduction <add>, %76, %cst_44 [1] : vector<8x8xf32> to vector<8xf32>
    %78 = vector.shape_cast %77 : vector<8xf32> to vector<8x1xf32>
    %79 = tpu.reciprocal %78 : vector<8x1xf32> -> vector<8x1xf32>
    %80 = vector.broadcast %79 : vector<8x1xf32> to vector<8x8xf32>
    %81 = arith.mulf %76, %80 : vector<8x8xf32>
    %c0_45 = arith.constant 0 : index
    %c2_46 = arith.constant 2 : index
    %c0_47 = arith.constant 0 : index
    %c0_48 = arith.constant 0 : index
    %82 = vector.load %arg21[%c0_45, %c2_46, %c0_47, %c0_48] : memref<1x4x8x8xf32, #tpu.memory_space<vmem>>, vector<1x1x8x8xf32>
    %83 = vector.shape_cast %82 : vector<1x1x8x8xf32> to vector<8x8xf32>
    %84 = vector.shape_cast %81 : vector<8x8xf32> to vector<1x1x8x8xf32>
    tpu.vector_store %arg21[%c0_45, %c2_46, %c0_47, %c0_48], %84 {strides = array<i32>} : memref<1x4x8x8xf32, #tpu.memory_space<vmem>>, vector<1x1x8x8xf32>,
    %85 = arith.truncf %81 : vector<8x8xf32> to vector<8x8xbf16>
    %c2_49 = arith.constant 2 : index
    %c0_50 = arith.constant 0 : index
    %c0_51 = arith.constant 0 : index
    %86 = vector.load %arg23[%c2_49, %c0_50, %c0_51] : memref<4x8x8xbf16, #tpu.memory_space<vmem>>, vector<1x8x8xbf16>
    %87 = vector.shape_cast %86 : vector<1x8x8xbf16> to vector<8x8xbf16>
    %cst_52 = arith.constant dense<0.000000e+00> : vector<8x8xf32>
    %88 = tpu.matmul %85, %87, %cst_52 {dimension_numbers = #tpu.dot_dimension_numbers<[1], [0], [0], [1], [0, 0, 1, 1], [], []>} : vector<8x8xbf16>, vector<8x8xbf16>, vector<8x8xf32> -> vector<8x8xf32>
    %c0_53 = arith.constant 0 : index
    %c16 = arith.constant 16 : index
    %89 = vector.load %arg24[%c0_53, %c16] : memref<8x32xf32, #tpu.memory_space<vmem>>, vector<8x8xf32>
    tpu.vector_store %arg24[%c0_53, %c16], %88 {strides = array<i32>} : memref<8x32xf32, #tpu.memory_space<vmem>>, vector<8x8xf32>,
    %90 = vector.extract_strided_slice %20 {offsets = [0, 24], sizes = [8, 8], strides = [1, 1]} : vector<8x32xbf16> to vector<8x8xbf16>
    %c3 = arith.constant 3 : index
    %c0_54 = arith.constant 0 : index
    %c0_55 = arith.constant 0 : index
    %91 = vector.load %arg22[%c3, %c0_54, %c0_55] : memref<4x8x8xbf16, #tpu.memory_space<vmem>>, vector<1x8x8xbf16>
    %92 = vector.shape_cast %91 : vector<1x8x8xbf16> to vector<8x8xbf16>
    %cst_56 = arith.constant dense<0.000000e+00> : vector<8x8xf32>
    %93 = tpu.matmul %90, %92, %cst_56 {dimension_numbers = #tpu.dot_dimension_numbers<[1], [1], [0], [0], [0, 0, 1, 0], [], []>} : vector<8x8xbf16>, vector<8x8xbf16>, vector<8x8xf32> -> vector<8x8xf32>
    %94 = arith.addf %93, %12 : vector<8x8xf32>
    %cst_57 = arith.constant dense<0xFF800000> : vector<8xf32>
    %95 = vector.multi_reduction <maximumf>, %94, %cst_57 [1] : vector<8x8xf32> to vector<8xf32>
    %96 = vector.shape_cast %95 : vector<8xf32> to vector<8x1xf32>
    %97 = vector.broadcast %96 : vector<8x1xf32> to vector<8x8xf32>
    %98 = arith.subf %94, %97 : vector<8x8xf32>
    %99 = math.exp %98 : vector<8x8xf32>
    %cst_58 = arith.constant dense<0.000000e+00> : vector<8xf32>
    %100 = vector.multi_reduction <add>, %99, %cst_58 [1] : vector<8x8xf32> to vector<8xf32>
    %101 = vector.shape_cast %100 : vector<8xf32> to vector<8x1xf32>
    %102 = tpu.reciprocal %101 : vector<8x1xf32> -> vector<8x1xf32>
    %103 = vector.broadcast %102 : vector<8x1xf32> to vector<8x8xf32>
    %104 = arith.mulf %99, %103 : vector<8x8xf32>
    %c0_59 = arith.constant 0 : index
    %c3_60 = arith.constant 3 : index
    %c0_61 = arith.constant 0 : index
    %c0_62 = arith.constant 0 : index
    %105 = vector.load %arg21[%c0_59, %c3_60, %c0_61, %c0_62] : memref<1x4x8x8xf32, #tpu.memory_space<vmem>>, vector<1x1x8x8xf32>
    %106 = vector.shape_cast %105 : vector<1x1x8x8xf32> to vector<8x8xf32>
    %107 = vector.shape_cast %104 : vector<8x8xf32> to vector<1x1x8x8xf32>
    tpu.vector_store %arg21[%c0_59, %c3_60, %c0_61, %c0_62], %107 {strides = array<i32>} : memref<1x4x8x8xf32, #tpu.memory_space<vmem>>, vector<1x1x8x8xf32>,
    %108 = arith.truncf %104 : vector<8x8xf32> to vector<8x8xbf16>
    %c3_63 = arith.constant 3 : index
    %c0_64 = arith.constant 0 : index
    %c0_65 = arith.constant 0 : index
    %109 = vector.load %arg23[%c3_63, %c0_64, %c0_65] : memref<4x8x8xbf16, #tpu.memory_space<vmem>>, vector<1x8x8xbf16>
    %110 = vector.shape_cast %109 : vector<1x8x8xbf16> to vector<8x8xbf16>
    %cst_66 = arith.constant dense<0.000000e+00> : vector<8x8xf32>
    %111 = tpu.matmul %108, %110, %cst_66 {dimension_numbers = #tpu.dot_dimension_numbers<[1], [0], [0], [1], [0, 0, 1, 1], [], []>} : vector<8x8xbf16>, vector<8x8xbf16>, vector<8x8xf32> -> vector<8x8xf32>
    %c0_67 = arith.constant 0 : index
    %c24 = arith.constant 24 : index
    %112 = vector.load %arg24[%c0_67, %c24] : memref<8x32xf32, #tpu.memory_space<vmem>>, vector<8x8xf32>
    tpu.vector_store %arg24[%c0_67, %c24], %111 {strides = array<i32>} : memref<8x32xf32, #tpu.memory_space<vmem>>, vector<8x8xf32>,
    %c0_68 = arith.constant 0 : index
    %c0_69 = arith.constant 0 : index
    %113 = vector.load %arg24[%c0_68, %c0_69] : memref<8x32xf32, #tpu.memory_space<vmem>>, vector<8x32xf32>
    %114 = arith.truncf %113 : vector<8x32xf32> to vector<8x32xbf16>
    %c0_70 = arith.constant 0 : index
    %c0_71 = arith.constant 0 : index
    %115 = vector.load %arg10[%c0_70, %c0_71] : memref<32x32xbf16, #tpu.memory_space<vmem>>, vector<32x32xbf16>
    %cst_72 = arith.constant dense<0.000000e+00> : vector<8x32xf32>
    %116 = tpu.matmul %114, %115, %cst_72 {dimension_numbers = #tpu.dot_dimension_numbers<[1], [0], [0], [1], [0, 0, 1, 1], [], []>} : vector<8x32xbf16>, vector<32x32xbf16>, vector<8x32xf32> -> vector<8x32xf32>
    %c0_73 = arith.constant 0 : index
    %c0_74 = arith.constant 0 : index
    %117 = vector.load %arg11[%c0_73, %c0_74] : memref<1x32xf32, #tpu.memory_space<vmem>>, vector<1x32xf32>
    %118 = vector.broadcast %117 : vector<1x32xf32> to vector<8x32xf32>
    %119 = arith.addf %116, %118 : vector<8x32xf32>
    %120 = arith.addf %119, %7 : vector<8x32xf32>
    %c0_75 = arith.constant 0 : index
    %c0_76 = arith.constant 0 : index
    %121 = vector.load %arg12[%c0_75, %c0_76] : memref<1x32xf32, #tpu.memory_space<vmem>>, vector<1x32xf32>
    %c0_77 = arith.constant 0 : index
    %c0_78 = arith.constant 0 : index
    %122 = vector.load %arg13[%c0_77, %c0_78] : memref<1x32xf32, #tpu.memory_space<vmem>>, vector<1x32xf32>
    %cst_79 = arith.constant dense<0.000000e+00> : vector<8xf32>
    %123 = vector.multi_reduction <add>, %120, %cst_79 [1] : vector<8x32xf32> to vector<8xf32>
    %124 = vector.shape_cast %123 : vector<8xf32> to vector<8x1xf32>
    %cst_80 = arith.constant 3.200000e+01 : f32
    %125 = vector.broadcast %cst_80 : f32 to vector<8x1xf32>
    %126 = arith.divf %124, %125 : vector<8x1xf32>
    %127 = vector.broadcast %126 : vector<8x1xf32> to vector<8x32xf32>
    %128 = arith.subf %120, %127 : vector<8x32xf32>
    %129 = arith.mulf %128, %128 : vector<8x32xf32>
    %cst_81 = arith.constant dense<0.000000e+00> : vector<8xf32>
    %130 = vector.multi_reduction <add>, %129, %cst_81 [1] : vector<8x32xf32> to vector<8xf32>
    %131 = vector.shape_cast %130 : vector<8xf32> to vector<8x1xf32>
    %cst_82 = arith.constant 3.200000e+01 : f32
    %132 = vector.broadcast %cst_82 : f32 to vector<8x1xf32>
    %133 = arith.divf %131, %132 : vector<8x1xf32>
    %cst_83 = arith.constant 9.99999996E-13 : f32
    %134 = vector.broadcast %cst_83 : f32 to vector<8x1xf32>
    %135 = arith.addf %133, %134 : vector<8x1xf32>
    %136 = math.rsqrt %135 : vector<8x1xf32>
    %137 = vector.broadcast %136 : vector<8x1xf32> to vector<8x32xf32>
    %138 = arith.mulf %128, %137 : vector<8x32xf32>
    %139 = vector.broadcast %121 : vector<1x32xf32> to vector<8x32xf32>
    %140 = arith.mulf %138, %139 : vector<8x32xf32>
    %141 = vector.broadcast %122 : vector<1x32xf32> to vector<8x32xf32>
    %142 = arith.addf %140, %141 : vector<8x32xf32>
    %143 = arith.truncf %142 : vector<8x32xf32> to vector<8x32xbf16>
    %c0_84 = arith.constant 0 : index
    %c0_85 = arith.constant 0 : index
    %144 = vector.load %arg14[%c0_84, %c0_85] : memref<32x64xbf16, #tpu.memory_space<vmem>>, vector<32x64xbf16>
    %cst_86 = arith.constant dense<0.000000e+00> : vector<8x64xf32>
    %145 = tpu.matmul %143, %144, %cst_86 {dimension_numbers = #tpu.dot_dimension_numbers<[1], [0], [0], [1], [0, 0, 1, 1], [], []>} : vector<8x32xbf16>, vector<32x64xbf16>, vector<8x64xf32> -> vector<8x64xf32>
    %c0_87 = arith.constant 0 : index
    %c0_88 = arith.constant 0 : index
    %146 = vector.load %arg15[%c0_87, %c0_88] : memref<1x64xf32, #tpu.memory_space<vmem>>, vector<1x64xf32>
    %147 = vector.broadcast %146 : vector<1x64xf32> to vector<8x64xf32>
    %148 = arith.addf %145, %147 : vector<8x64xf32>
    %149 = arith.truncf %148 : vector<8x64xf32> to vector<8x64xbf16>
    %150 = arith.mulf %149, %149 : vector<8x64xbf16>
    %151 = arith.mulf %149, %150 : vector<8x64xbf16>
    %cst_89 = arith.constant 4.467770e-02 : bf16
    %152 = vector.broadcast %cst_89 : bf16 to vector<8x64xbf16>
    %153 = arith.mulf %152, %151 : vector<8x64xbf16>
    %154 = arith.addf %149, %153 : vector<8x64xbf16>
    %cst_90 = arith.constant 7.968750e-01 : bf16
    %155 = vector.broadcast %cst_90 : bf16 to vector<8x64xbf16>
    %156 = arith.mulf %155, %154 : vector<8x64xbf16>
    %157 = math.tanh %156 : vector<8x64xbf16>
    %cst_91 = arith.constant 1.000000e+00 : bf16
    %158 = vector.broadcast %cst_91 : bf16 to vector<8x64xbf16>
    %159 = arith.addf %158, %157 : vector<8x64xbf16>
    %cst_92 = arith.constant 5.000000e-01 : bf16
    %160 = vector.broadcast %cst_92 : bf16 to vector<8x64xbf16>
    %161 = arith.mulf %160, %159 : vector<8x64xbf16>
    %162 = arith.mulf %149, %161 : vector<8x64xbf16>
    %c0_93 = arith.constant 0 : index
    %c0_94 = arith.constant 0 : index
    %163 = vector.load %arg16[%c0_93, %c0_94] : memref<64x32xbf16, #tpu.memory_space<vmem>>, vector<64x32xbf16>
    %cst_95 = arith.constant dense<0.000000e+00> : vector<8x32xf32>
    %164 = tpu.matmul %162, %163, %cst_95 {dimension_numbers = #tpu.dot_dimension_numbers<[1], [0], [0], [1], [0, 0, 1, 1], [], []>} : vector<8x64xbf16>, vector<64x32xbf16>, vector<8x32xf32> -> vector<8x32xf32>
    %c0_96 = arith.constant 0 : index
    %c0_97 = arith.constant 0 : index
    %165 = vector.load %arg17[%c0_96, %c0_97] : memref<1x32xf32, #tpu.memory_space<vmem>>, vector<1x32xf32>
    %166 = vector.broadcast %165 : vector<1x32xf32> to vector<8x32xf32>
    %167 = arith.addf %164, %166 : vector<8x32xf32>
    %168 = arith.addf %167, %142 : vector<8x32xf32>
    %c0_98 = arith.constant 0 : index
    %c0_99 = arith.constant 0 : index
    %169 = vector.load %arg18[%c0_98, %c0_99] : memref<1x32xf32, #tpu.memory_space<vmem>>, vector<1x32xf32>
    %c0_100 = arith.constant 0 : index
    %c0_101 = arith.constant 0 : index
    %170 = vector.load %arg19[%c0_100, %c0_101] : memref<1x32xf32, #tpu.memory_space<vmem>>, vector<1x32xf32>
    %cst_102 = arith.constant dense<0.000000e+00> : vector<8xf32>
    %171 = vector.multi_reduction <add>, %168, %cst_102 [1] : vector<8x32xf32> to vector<8xf32>
    %172 = vector.shape_cast %171 : vector<8xf32> to vector<8x1xf32>
    %cst_103 = arith.constant 3.200000e+01 : f32
    %173 = vector.broadcast %cst_103 : f32 to vector<8x1xf32>
    %174 = arith.divf %172, %173 : vector<8x1xf32>
    %175 = vector.broadcast %174 : vector<8x1xf32> to vector<8x32xf32>
    %176 = arith.subf %168, %175 : vector<8x32xf32>
    %177 = arith.mulf %176, %176 : vector<8x32xf32>
    %cst_104 = arith.constant dense<0.000000e+00> : vector<8xf32>
    %178 = vector.multi_reduction <add>, %177, %cst_104 [1] : vector<8x32xf32> to vector<8xf32>
    %179 = vector.shape_cast %178 : vector<8xf32> to vector<8x1xf32>
    %cst_105 = arith.constant 3.200000e+01 : f32
    %180 = vector.broadcast %cst_105 : f32 to vector<8x1xf32>
    %181 = arith.divf %179, %180 : vector<8x1xf32>
    %cst_106 = arith.constant 9.99999996E-13 : f32
    %182 = vector.broadcast %cst_106 : f32 to vector<8x1xf32>
    %183 = arith.addf %181, %182 : vector<8x1xf32>
    %184 = math.rsqrt %183 : vector<8x1xf32>
    %185 = vector.broadcast %184 : vector<8x1xf32> to vector<8x32xf32>
    %186 = arith.mulf %176, %185 : vector<8x32xf32>
    %187 = vector.broadcast %169 : vector<1x32xf32> to vector<8x32xf32>
    %188 = arith.mulf %186, %187 : vector<8x32xf32>
    %189 = vector.broadcast %170 : vector<1x32xf32> to vector<8x32xf32>
    %190 = arith.addf %188, %189 : vector<8x32xf32>
    %c0_107 = arith.constant 0 : index
    %c0_108 = arith.constant 0 : index
    %c0_109 = arith.constant 0 : index
    %191 = vector.load %arg20[%c0_107, %c0_108, %c0_109] : memref<1x8x32xf32, #tpu.memory_space<vmem>>, vector<1x8x32xf32>
    %192 = vector.shape_cast %191 : vector<1x8x32xf32> to vector<8x32xf32>
    %193 = vector.shape_cast %190 : vector<8x32xf32> to vector<1x8x32xf32>
    tpu.vector_store %arg20[%c0_107, %c0_108, %c0_109], %193 {strides = array<i32>} : memref<1x8x32xf32, #tpu.memory_space<vmem>>, vector<1x8x32xf32>,
    return
  }
  func.func @transform_0(%arg0: i32, %arg1: i32) -> (i32, i32, i32) {
    %c0_i32 = arith.constant 0 : i32
    %c0_i32_0 = arith.constant 0 : i32
    %c0_i32_1 = arith.constant 0 : i32
    return %arg0, %c0_i32, %c0_i32_0 : i32, i32, i32
  }
  func.func @transform_1(%arg0: i32, %arg1: i32) -> (i32, i32, i32) {
    %c0_i32 = arith.constant 0 : i32
    %c0_i32_0 = arith.constant 0 : i32
    %c0_i32_1 = arith.constant 0 : i32
    return %arg0, %c0_i32, %c0_i32_0 : i32, i32, i32
  }
  func.func @transform_2(%arg0: i32, %arg1: i32) -> (i32, i32) {
    %c0_i32 = arith.constant 0 : i32
    %c0_i32_0 = arith.constant 0 : i32
    %c0_i32_1 = arith.constant 0 : i32
    return %c0_i32, %c0_i32_0 : i32, i32
  }
  func.func @transform_3(%arg0: i32, %arg1: i32) -> (i32, i32) {
    %c0_i32 = arith.constant 0 : i32
    %c0_i32_0 = arith.constant 0 : i32
    %c0_i32_1 = arith.constant 0 : i32
    return %c0_i32, %c0_i32_0 : i32, i32
  }
  func.func @transform_4(%arg0: i32, %arg1: i32) -> (i32, i32) {
    %c0_i32 = arith.constant 0 : i32
    %c0_i32_0 = arith.constant 0 : i32
    %c0_i32_1 = arith.constant 0 : i32
    return %c0_i32, %c0_i32_0 : i32, i32
  }
  func.func @transform_5(%arg0: i32, %arg1: i32) -> (i32, i32) {
    %c0_i32 = arith.constant 0 : i32
    %c0_i32_0 = arith.constant 0 : i32
    %c0_i32_1 = arith.constant 0 : i32
    return %c0_i32, %c0_i32_0 : i32, i32
  }
  func.func @transform_6(%arg0: i32, %arg1: i32) -> (i32, i32) {
    %c0_i32 = arith.constant 0 : i32
    %c0_i32_0 = arith.constant 0 : i32
    %c0_i32_1 = arith.constant 0 : i32
    return %c0_i32, %c0_i32_0 : i32, i32
  }
  func.func @transform_7(%arg0: i32, %arg1: i32) -> (i32, i32) {
    %c0_i32 = arith.constant 0 : i32
    %c0_i32_0 = arith.constant 0 : i32
    %c0_i32_1 = arith.constant 0 : i32
    return %c0_i32, %c0_i32_0 : i32, i32
  }
  func.func @transform_8(%arg0: i32, %arg1: i32) -> (i32, i32) {
    %c0_i32 = arith.constant 0 : i32
    %c0_i32_0 = arith.constant 0 : i32
    %c0_i32_1 = arith.constant 0 : i32
    return %c0_i32, %c0_i32_0 : i32, i32
  }
  func.func @transform_9(%arg0: i32, %arg1: i32) -> (i32, i32) {
    %c0_i32 = arith.constant 0 : i32
    %c0_i32_0 = arith.constant 0 : i32
    %c0_i32_1 = arith.constant 0 : i32
    return %c0_i32, %c0_i32_0 : i32, i32
  }
  func.func @transform_10(%arg0: i32, %arg1: i32) -> (i32, i32) {
    %c0_i32 = arith.constant 0 : i32
    %c0_i32_0 = arith.constant 0 : i32
    %c0_i32_1 = arith.constant 0 : i32
    return %c0_i32, %c0_i32_0 : i32, i32
  }
  func.func @transform_11(%arg0: i32, %arg1: i32) -> (i32, i32) {
    %c0_i32 = arith.constant 0 : i32
    %c0_i32_0 = arith.constant 0 : i32
    %c0_i32_1 = arith.constant 0 : i32
    return %c0_i32, %c0_i32_0 : i32, i32
  }
  func.func @transform_12(%arg0: i32, %arg1: i32) -> (i32, i32) {
    %c0_i32 = arith.constant 0 : i32
    %c0_i32_0 = arith.constant 0 : i32
    %c0_i32_1 = arith.constant 0 : i32
    return %c0_i32, %c0_i32_0 : i32, i32
  }
  func.func @transform_13(%arg0: i32, %arg1: i32) -> (i32, i32) {
    %c0_i32 = arith.constant 0 : i32
    %c0_i32_0 = arith.constant 0 : i32
    %c0_i32_1 = arith.constant 0 : i32
    return %c0_i32, %c0_i32_0 : i32, i32
  }
  func.func @transform_14(%arg0: i32, %arg1: i32) -> (i32, i32) {
    %c0_i32 = arith.constant 0 : i32
    %c0_i32_0 = arith.constant 0 : i32
    %c0_i32_1 = arith.constant 0 : i32
    return %c0_i32, %c0_i32_0 : i32, i32
  }
  func.func @transform_15(%arg0: i32, %arg1: i32) -> (i32, i32) {
    %c0_i32 = arith.constant 0 : i32
    %c0_i32_0 = arith.constant 0 : i32
    %c0_i32_1 = arith.constant 0 : i32
    return %c0_i32, %c0_i32_0 : i32, i32
  }
  func.func @transform_16(%arg0: i32, %arg1: i32) -> (i32, i32) {
    %c0_i32 = arith.constant 0 : i32
    %c0_i32_0 = arith.constant 0 : i32
    %c0_i32_1 = arith.constant 0 : i32
    return %c0_i32, %c0_i32_0 : i32, i32
  }
  func.func @transform_17(%arg0: i32, %arg1: i32) -> (i32, i32) {
    %c0_i32 = arith.constant 0 : i32
    %c0_i32_0 = arith.constant 0 : i32
    %c0_i32_1 = arith.constant 0 : i32
    return %c0_i32, %c0_i32_0 : i32, i32
  }
  func.func @transform_18(%arg0: i32, %arg1: i32) -> (i32, i32, i32) {
    %c0_i32 = arith.constant 0 : i32
    %c0_i32_0 = arith.constant 0 : i32
    return %arg0, %arg1, %c0_i32 : i32, i32, i32
  }
  func.func @transform_19(%arg0: i32, %arg1: i32) -> (i32, i32, i32, i32) {
    %c0_i32 = arith.constant 0 : i32
    %c0_i32_0 = arith.constant 0 : i32
    %c0_i32_1 = arith.constant 0 : i32
    return %arg0, %c0_i32, %arg1, %c0_i32_0 : i32, i32, i32, i32
  }
}

</mosaic_0001>

<bundles_post_ra>
// kernel: tpu_custom_call.1
= control target key start
LH: loop header
LB: loop body
LE: loop exit
PB: predicated region body
PF: predicated region fallthrough
CT: control target
= control target key end

     0   :  { %6 = vsyncpa [#allocation3], 0  ;;  %s114_s0 = inlined_call_operand.hbm [shape: f32[8,128], index: 0, kind: input, shape index: {}]   ;;  %s115_s1 = inlined_call_operand.hbm [shape: f32[8,128], index: 1, kind: output, shape index: {}]  }
   0x1   :  { %7 = vsyncpa [#allocation4], 0  ;;  %s13_s8 = sshll.u32 %s114_s0, 4  ;;  %s96_s9 = smov [#allocation2]   ;;  %s14_s8 = int_to_ptr.hbm [resolvable:$true] %s13_s8 }
   0x2   :  { %s15_s10 = sshll.u32 %s96_s9, 4  ;;  %s16_s10 = int_to_ptr.vmem [resolvable:$true] %s15_s10 }
   0x3   :  { %18 = dma.hbm_to_vmem [thread:$0]  %s14_s8, 128, %s16_s10, [#allocation3]  }
   0x4   :  { %92 = dma.done.wait [#allocation3], 128  }
   0x5   :  { %93 = vsyncadd [#allocation3], 4294967168  ;;  %s97_s11 = smov [#allocation5]   ;;  %s32_s15 = sshll.u32 %s115_s1, 4  ;;  %v23_v0 = vld [vmem:[#allocation2] sm:$0xff]  ;;  %s33_s15 = int_to_ptr.hbm [resolvable:$true] %s32_s15 }
   0x6   :  { %s30_s12 = sshll.u32 %s97_s11, 4  ;;  %24 = vst [vmem:[#allocation5] sm:$0xff] %v23_v0  ;;  %s31_s12 = int_to_ptr.vmem [resolvable:$true] %s30_s12 }
   0x7   :  { %35 = dma.vmem_to_hbm [thread:$0]  %s31_s12, 128, %s33_s15, [#allocation4]  }
   0x8   :  { %94 = dma.done.wait [#allocation4], 128  }
   0x9   :  { %95 = vsyncadd [#allocation4], 4294967168 }
   0xa   :  { %40 = vsyncpa [#allocation3], 1 }
   0xb   :  { %41 = vsyncpa [#allocation4], 1 }

// kernel: tpu_custom_call.1
= control target key start
LH: loop header
LB: loop body
LE: loop exit
PB: predicated region body
PF: predicated region fallthrough
CT: control target
= control target key end

     0   :  { %s2545_s0 = inlined_call_operand.vmem [shape: f32[2,8,32], index: 0, kind: input, shape index: {}]   ;;  %s2546_s1 = inlined_call_operand.hbm [shape: f32[2,1,8], index: 1, kind: input, shape index: {}]   ;;  %s2547_s2 = inlined_call_operand.vmem [shape: bf16[32,32], index: 2, kind: input, shape index: {}]   ;;  %s2548_s3 = inlined_call_operand.vmem [shape: f32[1,32], index: 3, kind: input, shape index: {}]   ;;  %s2549_s4 = inlined_call_operand.vmem [shape: bf16[32,32], index: 4, kind: input, shape index: {}]   ;;  %s2550_s5 = inlined_call_operand.vmem [shape: f32[1,32], index: 5, kind: input, shape index: {}]   ;;  %s2551_s6 = inlined_call_operand.hbm [shape: bf16[32,32], index: 6, kind: input, shape index: {}]   ;;  %s2552_s7 = inlined_call_operand.vmem [shape: f32[1,32], index: 7, kind: input, shape index: {}]   ;;  %s2553_s8 = inlined_call_operand.hbm [shape: bf16[32,32], index: 8, kind: input, shape index: {}]   ;;  %s2554_s9 = inlined_call_operand.vmem [shape: f32[1,32], index: 9, kind: input, shape index: {}]   ;;  %s2555_s10 = inlined_call_operand.vmem [shape: f32[1,32], index: 10, kind: input, shape index: {}]   ;;  %s2556_s11 = inlined_call_operand.vmem [shape: f32[1,32], index: 11, kind: input, shape index: {}]   ;;  %s2557_s12 = inlined_call_operand.hbm [shape: bf16[32,64], index: 12, kind: input, shape index: {}]   ;;  %s2558_s13 = inlined_call_operand.vmem [shape: f32[1,64], index: 13, kind: input, shape index: {}]   ;;  %s2559_s14 = inlined_call_operand.vmem [shape: bf16[64,32], index: 14, kind: input, shape index: {}]   ;;  %s2560_s15 = inlined_call_operand.vmem [shape: f32[1,32], index: 15, kind: input, shape index: {}]   ;;  %s2561_s16 = inlined_call_operand.vmem [shape: f32[1,32], index: 16, kind: input, shape index: {}]   ;;  %s2562_s17 = inlined_call_operand.vmem [shape: f32[1,32], index: 17, kind: input, shape index: {}]   ;;  %s2563_s18 = inlined_call_operand.hbm [shape: f32[2,8,32], index: 18, kind: output, shape index: {0}]   ;;  %s2564_s19 = inlined_call_operand.hbm [shape: f32[2,4,8,8], index: 19, kind: output, shape index: {1}]  }
   0x1   :  { %2573 = sst [smem:[#allocation25_spill]] %s2545_s0 }
   0x2   :  { %2574 = sst [smem:[#allocation26_spill]] %s2546_s1 }
   0x3   :  { %2575 = sst [smem:[#allocation27_spill]] %s2547_s2 }
   0x4   :  { %2576 = sst [smem:[#allocation28_spill]] %s2548_s3 }
   0x5   :  { %2577 = sst [smem:[#allocation29_spill]] %s2549_s4 }
   0x6   :  { %2578 = sst [smem:[#allocation30_spill]] %s2550_s5 }
   0x7   :  { %2579 = sst [smem:[#allocation31_spill]] %s2551_s6 }
   0x8   :  { %2580 = sst [smem:[#allocation32_spill]] %s2553_s8 }
   0x9   :  { %2581 = sst [smem:[#allocation33_spill]] %s2557_s12 }
   0xa   :  { %2582 = sst [smem:[#allocation34_spill]] %s2561_s16 }
   0xb   :  { %2583 = sst [smem:[#allocation35_spill]] %s2562_s17 }
   0xc   :  { %2584 = sst [smem:[#allocation36_spill]] %s2563_s18 }
   0xd   :  { %2585 = sst [smem:[#allocation37_spill]] %s2564_s19 }
   0xe   :  { %25 = vsyncpa [#allocation6], 0 }
   0xf   :  { %27 = vsyncpa [#allocation6 + $0x1], 0 }
  0x10   :  { %28 = vsyncpa [#allocation9], 0 }
  0x11   :  { %29 = vsyncpa [#allocation12], 0 }
  0x12   :  { %30 = vsyncpa [#allocation7], 0 }
  0x13   :  { %32 = vsyncpa [#allocation7 + $0x1], 0 }
  0x14   :  { %33 = vsyncpa [#allocation15], 0 }
  0x15   :  { %35 = vsyncpa [#allocation15 + $0x1], 0  ;;  %s2206_s0 = smov 0   ;;  %s2208_s30 = smov 0  }
  0x16   :  { %s2210_s20 = smov 0   ;;  %s2212_s21 = smov 0  }
  0x17   :  { %s2214_s1 = smov 0   ;;  %s2216_s22 = smov 0  }
  0x18 LB: > { %2586 = sst [smem:[#allocation21_spill]] %s2071_s0  ;;  %s2566_s2 = sadd.s32 4294967295, %s2091_s22   ;;  %s2091_s22 = sphi %s2216_s22, %s41_s22   ;;  %s2087_s1 = sphi %s2214_s1, %s2617_s1   ;;  %s2083_s21 = sphi %s2212_s21, %s2616_s21   ;;  %s2079_s20 = sphi %s2210_s20, %s2620_s20   ;;  %s2075_s30 = sphi %s2208_s30, %s2619_s30   ;;  %s2071_s0 = sphi %s2206_s0, %s2618_s0  }
  0x19   : > { %2587 = sst [smem:[#allocation22_spill]] %s2087_s1  ;;  %p1599_p0 = scmp.ge.s32.totalorder %s2091_s22, 1 }
  0x1a   : > { %p2240_p1 = scmp.eq.s32.totalorder %s2566_s2, 0  ;;  %p502_p2 = scmp.lt.s32.totalorder %s2091_s22, 3 }
  0x1b   : > { %s2589_s6 = sld [smem:[#allocation31_spill]]  ;;  %s2093_s27 = smov [#allocation8]  }
  0x1c   : > { %p2248_p3 = pnand %p1599_p0, %p502_p2  ;;  %s527_s28 = sshll.u32 %s2093_s27, 4  ;;  %s528_s28 = int_to_ptr.vmem [resolvable:$true] %s527_s28 }
  0x1d   : > { %p1603_p6 = scmp.ge.s32.totalorder %s2091_s22, 2  ;;  %s2592_s8 = sld [smem:[#allocation32_spill]] }
  0x1e   : > { %p1724_p4 = pneg %p2248_p3  ;;  %s2095_s27 = smov 4  }
  0x1f   : > { %s2096_s17 = smov [#allocation10]   ;;  %s2593_s12 = sld [smem:[#allocation33_spill]] }
  0x20   : > { %p2256_p5 = pnand %p1724_p4, %p2240_p1  ;;  %s544_s18 = sshll.u32 %s2096_s17, 4  ;;  %s545_s18 = int_to_ptr.vmem [resolvable:$true] %s544_s18 }
  0x21   : > { %s525_s3 = sshll.u32 %s2589_s6, 4  ;;  %s2094_s6 = smov 64   ;;  %s526_s3 = int_to_ptr.hbm [resolvable:$true] %s525_s3 }
  0x22   : > { %1727 = dma.hbm_to_vmem [thread:$0]  (!%p2256_p5), %s526_s3, 256, %s528_s28, [#allocation9], %s2094_s6, %s2094_s6, %s2095_s27  }
  0x23   : > { %s542_s2 = sshll.u32 %s2592_s8, 4  ;;  %s2097_s25 = smov [#allocation11]   ;;  %s543_s2 = int_to_ptr.hbm [resolvable:$true] %s542_s2 }
  0x24   : > { %1730 = dma.hbm_to_vmem [thread:$0]  (!%p2256_p5), %s543_s2, 256, %s545_s18, [#allocation9], %s2094_s6, %s2094_s6, %s2095_s27  }
  0x25   : > { %s565_s24 = sshll.u32 %s2593_s12, 4  ;;  %s567_s8 = sshll.u32 %s2097_s25, 4  ;;  %s566_s24 = int_to_ptr.hbm [resolvable:$true] %s565_s24  ;;  %s568_s8 = int_to_ptr.vmem [resolvable:$true] %s567_s8 }
  0x26   : > { %1733 = dma.hbm_to_vmem [thread:$0]  (!%p2256_p5), %s566_s24, 256, %s568_s8, [#allocation12], %s2094_s6, %s2094_s6, %s2095_s27  }
  0x27   : > { %s1598_s3 = sadd.s32 4294967294, %s2091_s22   ;;  %s53_s17 = sadd.s32 1, %s2087_s1 }
  0x28   : > { %s86_s28 = sadd.s32 1, %s2079_s20  ;;  %p55_p7 = scmp.ge.s32.totalorder %s53_s17, 2 }
  0x29   : > { %p93_p8 = scmp.ne.s32.totalorder %s2079_s20, %s2075_s30  ;;  %p94_p9 = scmp.eq.s32.totalorder %s2091_s22, 0 }
  0x2a   : > { %p99_p10 = scmp.ne.s32.totalorder %s2075_s30, %s2071_s0  ;;  %s2622_s17 = smov (%p55_p7, %s53_s17), 0 }
  0x2b   : > { %2594 = sst [smem:[#allocation23_spill]] %s2622_s17  ;;  %p2283_p11 = por %p94_p9, %p93_p8 }
  0x2c   : > { %p2289_p12 = por %p2240_p1, %p99_p10  ;;  %s83_s8 = ssub.s32 %s2087_s1, %s2622_s17 }
  0x2d   : > { %s2597_s18 = sadd.s32 4294967295, %s2091_s22   ;;  %p84_p0 = scmp.eq.s32.totalorder %s83_s8, 0 }
  0x2e   : > { %p461_p13 = scmp.eq.s32.totalorder %s2597_s18, 1  ;;  %p467_p2 = scmp.eq.s32.totalorder %s1598_s3, 1 }
  0x2f   : > { %p1748_p5 = scmp.lt.s32.totalorder %s2091_s22, 2  ;;  %s603_s27 = sand.u32 1, %s2079_s20  }
  0x30   : > { %p2297_p4 = por %p461_p13, %p93_p8  ;;  %p2305_p7 = por %p467_p2, %p99_p10 }
  0x31   : > { %s2303_s2 = scalar_select %p84_p0, %s2079_s20, %s86_s28  }
  0x32   : > { %s2601_s12 = sld [smem:[#allocation26_spill]]  ;;  %s606_s0 = scalar_lea.vmem [#allocation5], %s603_s27 }
  0x33   : > { %2599 = sst [smem:[#allocation24_spill]] %s2303_s2  ;;  %s613_s18 = sshll.u32 %s606_s0, 4  ;;  %s614_s18 = int_to_ptr.vmem [resolvable:$true] %s613_s18 }
  0x34   : > { %p1735_p8 = pnand %p1748_p5, %p2283_p11  ;;  %s604_s3 = scalar_lea.sflag [#allocation6], %s603_s27 }
  0x35   : > { %s2319_s28 = sand.u32 (!%p2248_p3), 1, %s2075_s30  }
  0x36   : > { %622 = sbr.rel (%p2248_p3) target bundleno = 2022 (0x7e6), region = 92  ;;  %s625_s24 = scalar_lea.sflag (!%p2248_p3), [#allocation6], %s2319_s28 }
  0x38   : > { %s609_s17 = scalar_lea.hbm %s2601_s12, %s2087_s1 }
  0x39   : > { %s611_s8 = sshll.u32 %s609_s17, 4  ;;  %s612_s8 = int_to_ptr.hbm [resolvable:$true] %s611_s8 }
  0x3a   : > { %1737 = dma.hbm_to_vmem [thread:$0]  (!%p1735_p8), %s612_s8, 16, %s614_s18, %s604_s3  }
  0x3b   : > { %2050 = dma.done.wait (%p2289_p12), %s625_s24, 16  }
  0x3c   : > { %2052 = vsyncadd (%p2289_p12), %s625_s24, 4294967280 }
  0x3d   : > { %2054 = dma.done.wait (%p2240_p1), [#allocation9], 512  }
  0x3e   : > { %2056 = vsyncadd (%p2240_p1), [#allocation9], 4294966784 }
  0x3f   : > { %2058 = dma.done.wait (%p2240_p1), [#allocation12], 256  }
  0x40   : > { %2060 = vsyncadd (%p2240_p1), [#allocation12], 4294967040  ;;  %p706_p3 = scmp.lt.s32.totalorder %s2083_s21, 1  ;;  %s2602_s6 = sld [smem:[#allocation25_spill]]  ;;  %vm737_vm0 = vcmask 261120   ;;  %v1694_v6 = vld [vmem:[#allocation8 + $0x8] sm:$0xff] }
  0x41   : > { %s2603_s4 = sld [smem:[#allocation29_spill]]  ;;  %781 = vmatpush.bf16.msra.mxu1 %v1694_v6  ;;  %vm789_vm1 = vcmask 60416   ;;  %s2098_s17 = smov 104   ;;  %vm872_vm2 = vcmask 64512   ;;  %v1693_v22 = vld [vmem:[#allocation8] sm:$0xff]  ;;  %vm922_vm3 = vcmask 1043456  }
  0x42   : > { %s707_s0 = scalar_select %p706_p3, %s2083_s21, 1  ;;  %v1817_v40 = vld [vmem:[%s2552_s7] ss:$0 sm:$0xff] }
  0x43   : > { %s2604_s24 = sld [smem:[#allocation27_spill]]  ;;  %s2099_s16 = smov 120  }
  0x44   : > { %s1610_s26 = sshll.u32 %s707_s0, 3  ;;  %s2605_s5 = sld [smem:[#allocation30_spill]] }
  0x45   : > { %782 = vmatpush.bf16.msra.mxu1 %v1693_v22  ;;  %s1609_s8 = sshll.u32 %s2319_s28, 5  ;;  %s2572_s23 = smov 8  }
  0x46   : > { %s709_s27 = scalar_lea.vmem %s2602_s6, %s1610_s26  ;;  %s2606_s26 = sld [smem:[#allocation28_spill]] }
  0x47   : > { %v1692_v0 = vld [vmem:[%s2603_s4 + $0x8] sm:$0xff]  ;;  %v1691_v2 = vld [vmem:[%s2603_s4] sm:$0xff]  ;;  %s2100_s6 = smov 112   ;;  %s2414_s3 = scalar_lea.vmem [#allocation14], %s1609_s8 }
  0x48   : > { %747 = vmatpush.bf16.msra.mxu0 %v1692_v0  ;;  %v2352_v4 = vld [vmem:[%s709_s27] sm:$0xff]  ;;  %s2607_s27 = scalar_lea.vmem [#allocation5], %s2319_s28  ;;  %s2102_s12 = smov 24  }
  0x49   : > { %v1696_v1 = vld [vmem:[%s2604_s24 + $0x8] sm:$0xff]  ;;  %v1695_v3 = vld [vmem:[%s2604_s24] sm:$0xff]  ;;  %v716_v5 = vpack.c.bf16 %v2352_v4, %v2352_v4  ;;  %s2103_s0 = smov 16   ;;  %s2608_s8 = sld [smem:[#allocation37_spill]] }
  0x4a   : > { %862 = vmatpush.bf16.msra.mxu2 %v1696_v1  ;;  %v1814_v7 = vld [vmem:[%s2605_s5] ss:$0 sm:$0xff]  ;;  %s1410_s2 = scalar_lea.sflag [#allocation15], %s2319_s28 }
  0x4b   : > { %1628 = vmatmul.msk.bf16.vlgmr.msra.gmra.mxu1 %vm737_vm0, %v716_v5  ;;  %v1816_v34 = vld [vmem:[%s2607_s27] ss:$0 sm:$0xff]  ;;  %s1705_s27 = sshll.u32 %s2083_s21, 5 }
  0x4c   : > { %748 = vmatpush.bf16.msra.mxu0 %v1691_v2  ;;  %v1815_v11 = vld [vmem:[%s2606_s26] ss:$0 sm:$0xff] }
  0x4e   : > { %863 = vmatpush.bf16.msra.mxu2 %v1695_v3 }
  0x4f   : > { %1619 = vmatmul.msk.bf16.vlgmr.msra.gmra.mxu0 %vm737_vm0, %v716_v5 }
  0x51   : > { %1637 = vmatmul.msk.bf16.vlgmr.msra.gmra.mxu2 %vm737_vm0, %v716_v5 }
  0xc8   : > { %v784_v41 = vpop.f32.mrf.mxu1 }
  0xc9   : > { %v785_v42 = vadd.f32 %v1817_v40, %v784_v41 }
  0xcb   : > { %v2389_v43 = vpack.c.bf16 %v785_v42, %v785_v42 }
  0xcc   : > { %v750_v8 = vpop.f32.mrf.mxu0 }
  0xcd   : > { %v751_v9 = vadd.f32 %v1814_v7, %v750_v8  ;;  %791 = vst.msk [vmem:[#allocation3] sm:$0xf] %vm789_vm1, %v2389_v43 }
  0xcf   : > { %v754_v10 = vpack.c.bf16 %v751_v9, %v751_v9 }
  0xd0   : > { %v786_v44 = vpop.f32.mrf.mxu1 }
  0xd1   : > { %790 = vst.msk [vmem:[#allocation2] sm:$0xf] %vm789_vm1, %v754_v10  ;;  %814 = vrot.lane.b32.xlu1 %v754_v10, %s2098_s17  ;;  %793 = vrot.lane.b32.xlu0 %v754_v10, %s2099_s16 }
  0xd4   : > { %v865_v12 = vpop.f32.mrf.mxu2  ;;  %v752_v14 = vpop.f32.mrf.mxu0  ;;  %v918_v45 = vld [vmem:[#allocation3] sm:$0xf] }
  0xd5   : > { %v866_v13 = vadd.f32 %v1815_v11, %v865_v12  ;;  %v924_v46 = vsel %vm922_vm3, %v918_v45, 0 }
  0xd6   : > { %933 = vmatpush.bf16.msrb.mxu0 %v924_v46 }
  0xd7   : > { %v869_v15 = vmul.f32 0.35355338, %v866_v13 }
  0xd8   : > { %v871_v17 = vld [vmem:[#allocation2] sm:$0xf] }
  0xd9   : > { %v870_v16 = vpack.c.bf16 %v869_v15, %v869_v15  ;;  %804 = vrot.lane.b32.xlu0 %v754_v10, %s2100_s6  ;;  %v877_v19 = vsel %vm872_vm2, %v871_v17, 0 }
  0xda   : > { %886 = vmatpush.bf16.xpose.msra.mxu3 %v877_v19 }
  0xdb   : > { %v943_v18 = vunpack.c.l.b16 %v870_v16 }
  0xdc   : > { %v867_v20 = vpop.f32.mrf.mxu2 }
  0xdd   : > { %v944_v21 = vpack.c.b16 %v943_v18, %v943_v18 }
  0xdf   : > { %1022 = vrot.lane.b32.xlu2 %v944_v21, %s2100_s6  ;;  %945 = vrot.lane.b32.xlu1 %v944_v21, %s2099_s16 }
  0xe1   : > { %1638 = vmatmul.msk.bf16.vlgmr.msra.gmra.mxu3 %vm872_vm2, %v870_v16 }
  0xe7   : > { %1099 = vrot.lane.b32.xlu2 %v944_v21, %s2098_s17 }
 0x139   : > { %v1023_v33 = vpop.permute.xlu2 %1022 }
 0x141   : > { %v1100_v35 = vpop.permute.xlu2 %1099 }
 0x143   : > { %v815_v23 = vpop.permute.xlu1 %814  ;;  %v794_v24 = vpop.permute.xlu0 %793 }
 0x144   : > { %818 = vst.msk [vmem:[#allocation2 + $0xc] sm:$0xf] %vm789_vm1, %v815_v23 }
 0x145   : > { %797 = vst.msk [vmem:[#allocation2 + $0x4] sm:$0xf] %vm789_vm1, %v794_v24 }
 0x14b   : > { %v805_v25 = vpop.permute.xlu0 %804  ;;  %v1098_v26 = vld [vmem:[#allocation2 + $0xc] sm:$0xf] }
 0x14c   : > { %808 = vst.msk [vmem:[#allocation2 + $0x8] sm:$0xf] %vm789_vm1, %v805_v25  ;;  %v941_v27 = vld [vmem:[#allocation2 + $0x4] sm:$0xf]  ;;  %v1105_v28 = vsel %vm872_vm2, %v1098_v26, 0 }
 0x14d   : > { %v951_v29 = vsel %vm872_vm2, %v941_v27, 0 }
 0x14e   : > { %960 = vmatpush.bf16.xpose.msrb.mxu1 %v951_v29 }
 0x151   : > { %v946_v30 = vpop.permute.xlu1 %945 }
 0x153   : > { %v1021_v31 = vld [vmem:[#allocation2 + $0x8] sm:$0xf] }
 0x154   : > { %v1028_v32 = vsel %vm872_vm2, %v1021_v31, 0 }
 0x155   : > { %1640 = vmatmul.msk.bf16.vlgmr.msrb.gmra.mxu1 %vm872_vm2, %v946_v30  ;;  %1037 = vmatpush.bf16.xpose.msrb.mxu3 %v1028_v32 }
 0x156   : > { %1114 = vmatpush.bf16.xpose.msra.mxu1 %v1105_v28 }
 0x15c   : > { %1643 = vmatmul.msk.bf16.vlgmr.msrb.gmra.mxu3 %vm872_vm2, %v1023_v33 }
 0x164   : > { %v888_v36 = vpop.f32.mrf.mxu3 }
 0x165   : > { %v889_v37 = vadd.f32 %v1816_v34, %v888_v36  ;;  %1646 = vmatmul.msk.bf16.vlgmr.msra.gmra.mxu1 %vm872_vm2, %v1100_v35 }
 0x167   : > { %v892_v38 = vsel %vm872_vm2, %v889_v37, -inf }
 0x168   : > { %893 = vmax.xlane.f32.xlu1 %v892_v38 }
 0x16c   : > { %v890_v39 = vpop.f32.mrf.mxu3 }
 0x1d2   : > { %v962_v47 = vpop.f32.mrf.mxu1 }
 0x1d3   : > { %v963_v48 = vadd.f32 %v1816_v34, %v962_v47 }
 0x1d5   : > { %v966_v49 = vsel %vm872_vm2, %v963_v48, -inf }
 0x1d6   : > { %967 = vmax.xlane.f32.xlu0 %v966_v49 }
 0x1da   : > { %v964_v50 = vpop.f32.mrf.mxu1 }
 0x1db   : > { %v894_v51 = vpop.xlane.xlu1 %893 }
 0x1dc   : > { %v895_v52 = vsub.f32 %v889_v37, %v894_v51 }
 0x1de   : > { %v896_v53 = vmul.f32 1.442695, %v895_v52 }
 0x1df   : > { %v1039_v54 = vpop.f32.mrf.mxu3 }
 0x1e0   : > { %1825 = vpow2.f32 %v896_v53  ;;  %v1040_v61 = vadd.f32 %v1816_v34, %v1039_v54 }
 0x1e2   : > { %v1116_v55 = vpop.f32.mrf.mxu1  ;;  %v1043_v63 = vsel %vm872_vm2, %v1040_v61, -inf }
 0x1e3   : > { %v1117_v56 = vadd.f32 %v1816_v34, %v1116_v55 }
 0x1e5   : > { %v1120_v57 = vsel %vm872_vm2, %v1117_v56, -inf }
 0x1e6   : > { %v1826_v58 = vpop.eup %1825  ;;  %1121 = vmax.xlane.f32.xlu2 %v1120_v57 }
 0x1e7   : > { %v1041_v59 = vpop.f32.mrf.mxu3  ;;  %v898_v60 = vsel %vm872_vm2, %v1826_v58, 0.0 }
 0x1e8   : > { %899 = vadd.xlane.f32.xlu1 %v898_v60 }
 0x1ea   : > { %v1118_v62 = vpop.f32.mrf.mxu1 }
 0x1ee   : > { %1044 = vmax.xlane.f32.xlu2 %v1043_v63 }
 0x206   : > { %799 = vrot.lane.b32.xlu2 %v2389_v43, %s2099_s16 }
 0x249   : > { %v968_v0 = vpop.xlane.xlu0 %967 }
 0x24a   : > { %v969_v1 = vsub.f32 %v963_v48, %v968_v0 }
 0x24c   : > { %v970_v2 = vmul.f32 1.442695, %v969_v1 }
 0x24e   : > { %1827 = vpow2.f32 %v970_v2 }
 0x254   : > { %v2400_v3 = vpop.eup %1827 }
 0x255   : > { %v972_v5 = vsel %vm872_vm2, %v2400_v3, 0.0 }
 0x256   : > { %973 = vadd.xlane.f32.xlu0 %v972_v5 }
 0x259   : > { %v1122_v6 = vpop.xlane.xlu2 %1121 }
 0x25a   : > { %v1123_v7 = vsub.f32 %v1117_v56, %v1122_v6 }
 0x25b   : > { %v900_v8 = vpop.xlane.xlu1 %899 }
 0x25c   : > { %v1124_v9 = vmul.f32 1.442695, %v1123_v7  ;;  %1829 = vrcp.f32 %v900_v8  ;;  %v912_v18 = vand.u32 2147483648, %v900_v8  ;;  %v910_v20 = vand.u32 2147483647, %v900_v8 }
 0x25d   : > { %vm906_vm5 = vweird.f32 %v900_v8 }
 0x25e   : > { %1831 = vpow2.f32 %v1124_v9  ;;  %v913_v23 = vor.u32 1.1754944e-38, %v912_v18  ;;  %vm911_vm7 = vcmp.eq.f32.partialorder %v910_v20, 8.507059e+37 }
 0x261   : > { %v1045_v10 = vpop.xlane.xlu2 %1044 }
 0x262   : > { %v1830_v11 = vpop.eup %1829  ;;  %v1046_v12 = vsub.f32 %v1040_v61, %v1045_v10 }
 0x263   : > { %v902_v13 = vmul.f32 %v1830_v11, %v900_v8  ;;  %vm907_vm4 = vweird.f32 %v1830_v11 }
 0x264   : > { %v2404_v14 = vpop.eup %1831  ;;  %v1047_v15 = vmul.f32 1.442695, %v1046_v12  ;;  %vm908_vm6 = vmor %vm906_vm5, %vm907_vm4 }
 0x265   : > { %v903_v16 = vsub.f32 1.0, %v902_v13  ;;  %v1126_v17 = vsel %vm872_vm2, %v2404_v14, 0.0 }
 0x266   : > { %1833 = vpow2.f32 %v1047_v15  ;;  %1127 = vadd.xlane.f32.xlu0 %v1126_v17 }
 0x267   : > { %v904_v19 = vmul.f32 %v1830_v11, %v903_v16 }
 0x269   : > { %v905_v21 = vadd.f32 %v1830_v11, %v904_v19  ;;  %v800_v22 = vpop.permute.xlu2 %799 }
 0x26a   : > { %803 = vst.msk [vmem:[#allocation3 + $0x4] sm:$0xf] %vm789_vm1, %v800_v22 }
 0x26b   : > { %v909_v24 = vsel %vm908_vm6, %v1830_v11, %v905_v21 }
 0x26c   : > { %v2410_v25 = vpop.eup %1833  ;;  %v914_v26 = vsel %vm911_vm7, %v913_v23, %v909_v24  ;;  %v1698_v23 = vld [vmem:[#allocation10 + $0x8] sm:$0xff]  ;;  %v1697_v24 = vld [vmem:[#allocation10] sm:$0xff] }
 0x26d   : > { %v1049_v27 = vsel %vm872_vm2, %v2410_v25, 0.0  ;;  %v915_v28 = vmul.f32 %v1826_v58, %v914_v26  ;;  %1205 = vmatpush.bf16.msra.mxu3 %v1698_v23 }
 0x26e   : > { %1050 = vadd.xlane.f32.xlu1 %v1049_v27 }
 0x26f   : > { %916 = vst.msk [vmem:[%s2414_s3] sm:$0xff] %vm872_vm2, %v915_v28  ;;  %v917_v29 = vpack.c.bf16 %v915_v28, %v915_v28 }
 0x271   : > { %1639 = vmatmul.msk.bf16.vlgmr.msrb.gmra.mxu0 %vm872_vm2, %v917_v29  ;;  %v994_v30 = vld [vmem:[#allocation3 + $0x4] sm:$0xf]  ;;  %1206 = vmatpush.bf16.msra.mxu3 %v1697_v24  ;;  %v1818_v29 = vld [vmem:[%s2554_s9] ss:$0 sm:$0xff] }
 0x272   : > { %v999_v31 = vsel %vm922_vm3, %v994_v30, 0 }
 0x273   : > { %1008 = vmatpush.bf16.msrb.mxu2 %v999_v31 }
 0x27a   : > { %819 = vrot.lane.b32.xlu0 %v2389_v43, %s2098_s17 }
 0x287   : > { %809 = vrot.lane.b32.xlu1 %v2389_v43, %s2100_s6 }
 0x2c9   : > { %v974_v32 = vpop.xlane.xlu0 %973 }
 0x2ca   : > { %1835 = vrcp.f32 %v974_v32  ;;  %v986_v37 = vand.u32 2147483648, %v974_v32  ;;  %v984_v38 = vand.u32 2147483647, %v974_v32  ;;  %vm980_vm9 = vweird.f32 %v974_v32 }
 0x2cc   : > { %v987_v41 = vor.u32 1.1754944e-38, %v986_v37  ;;  %vm985_vm11 = vcmp.eq.f32.partialorder %v984_v38, 8.507059e+37 }
 0x2d0   : > { %v1836_v33 = vpop.eup %1835 }
 0x2d1   : > { %v976_v34 = vmul.f32 %v1836_v33, %v974_v32  ;;  %vm981_vm8 = vweird.f32 %v1836_v33 }
 0x2d2   : > { %vm982_vm10 = vmor %vm980_vm9, %vm981_vm8 }
 0x2d3   : > { %v977_v35 = vsub.f32 1.0, %v976_v34 }
 0x2d5   : > { %v978_v36 = vmul.f32 %v1836_v33, %v977_v35  ;;  %v2104_v35 = vmov 32.0  }
 0x2d7   : > { %v979_v39 = vadd.f32 %v1836_v33, %v978_v36 }
 0x2d9   : > { %v983_v40 = vsel %vm982_vm10, %v1836_v33, %v979_v39  ;;  %v1128_v42 = vpop.xlane.xlu0 %1127 }
 0x2da   : > { %1837 = vrcp.f32 %v1128_v42  ;;  %v988_v44 = vsel %vm985_vm11, %v987_v41, %v983_v40  ;;  %v1140_v50 = vand.u32 2147483648, %v1128_v42  ;;  %v1138_v52 = vand.u32 2147483647, %v1128_v42 }
 0x2db   : > { %v989_v43 = vmul.f32 %v2400_v3, %v988_v44  ;;  %vm1134_vm13 = vweird.f32 %v1128_v42 }
 0x2dc   : > { %v1141_v55 = vor.u32 1.1754944e-38, %v1140_v50  ;;  %vm1139_vm15 = vcmp.eq.f32.partialorder %v1138_v52, 8.507059e+37 }
 0x2dd   : > { %1641 = vst.msk [vmem:[%s2414_s3 + $0x8] sm:$0xff] %vm872_vm2, %v989_v43  ;;  %v992_v45 = vpack.c.bf16 %v989_v43, %v989_v43 }
 0x2df   : > { %1642 = vmatmul.msk.bf16.vlgmr.msrb.gmra.mxu2 %vm872_vm2, %v992_v45 }
 0x2e0   : > { %v1838_v46 = vpop.eup %1837 }
 0x2e1   : > { %v1130_v47 = vmul.f32 %v1838_v46, %v1128_v42  ;;  %v1051_v48 = vpop.xlane.xlu1 %1050  ;;  %vm1135_vm12 = vweird.f32 %v1838_v46 }
 0x2e2   : > { %1839 = vrcp.f32 %v1051_v48  ;;  %vm1136_vm14 = vmor %vm1134_vm13, %vm1135_vm12  ;;  %v1063_v61 = vand.u32 2147483648, %v1051_v48  ;;  %v1061_v0 = vand.u32 2147483647, %v1051_v48  ;;  %vm1057_vm5 = vweird.f32 %v1051_v48 }
 0x2e3   : > { %v1131_v49 = vsub.f32 1.0, %v1130_v47  ;;  %1841 = vrcp.f32 %v2104_v35  ;;  %v1699_v47 = vld [vmem:[#allocation11] sm:$0xff]  ;;  %vm1353_vm12 = vcmask 523264  }
 0x2e4   : > { %v1064_v3 = vor.u32 1.1754944e-38, %v1063_v61  ;;  %vm1062_vm7 = vcmp.eq.f32.partialorder %v1061_v0, 8.507059e+37  ;;  %v1821_v0 = vld [vmem:[%s2558_s13] ss:$0 sm:$0xff] }
 0x2e5   : > { %v1132_v51 = vmul.f32 %v1838_v46, %v1131_v49 }
 0x2e7   : > { %v1133_v53 = vadd.f32 %v1838_v46, %v1132_v51 }
 0x2e8   : > { %v1840_v54 = vpop.eup %1839 }
 0x2e9   : > { %v1137_v56 = vsel %vm1136_vm14, %v1838_v46, %v1133_v53  ;;  %v1053_v57 = vmul.f32 %v1840_v54, %v1051_v48  ;;  %vm1058_vm4 = vweird.f32 %v1840_v54  ;;  %v1842_v36 = vpop.eup %1841  ;;  %v1700_v46 = vld [vmem:[#allocation11 + $0x8] sm:$0xff] }
 0x2ea   : > { %v1142_v58 = vsel %vm1139_vm15, %v1141_v55, %v1137_v56  ;;  %vm1059_vm6 = vmor %vm1057_vm5, %vm1058_vm4  ;;  %v1219_v37 = vmul.f32 32.0, %v1842_v36  ;;  %vm1223_vm8 = vweird.f32 %v1842_v36 }
 0x2eb   : > { %v1143_v59 = vmul.f32 %v2404_v14, %v1142_v58  ;;  %v1054_v60 = vsub.f32 1.0, %v1053_v57  ;;  %v1819_v57 = vld [vmem:[%s2555_s10] ss:$0 sm:$0xff] }
 0x2ec   : > { %v820_v62 = vpop.permute.xlu0 %819  ;;  %v1220_v38 = vsub.f32 1.0, %v1219_v37  ;;  %v1822_v37 = vld [vmem:[%s2560_s15] ss:$0 sm:$0xff] }
 0x2ed   : > { %1647 = vst.msk [vmem:[%s2414_s3 + $0x18] sm:$0xff] %vm872_vm2, %v1143_v59  ;;  %v1055_v63 = vmul.f32 %v1840_v54, %v1054_v60  ;;  %v1146_v11 = vpack.c.bf16 %v1143_v59, %v1143_v59  ;;  %v1820_v59 = vld [vmem:[%s2556_s11] ss:$0 sm:$0xff] }
 0x2ee   : > { %823 = vst.msk [vmem:[#allocation3 + $0xc] sm:$0xf] %vm789_vm1, %v820_v62  ;;  %v935_v1 = vpop.f32.mrf.mxu0  ;;  %v1221_v39 = vmul.f32 %v1842_v36, %v1220_v38 }
 0x2ef   : > { %v1056_v2 = vadd.f32 %v1840_v54, %v1055_v63  ;;  %939 = vst.msk [vmem:[#allocation4] sm:$0xff] %vm872_vm2, %v935_v1 }
 0x2f0   : > { %v1222_v40 = vadd.f32 %v1842_v36, %v1221_v39 }
 0x2f1   : > { %v1060_v5 = vsel %vm1059_vm6, %v1840_v54, %v1056_v2 }
 0x2f2   : > { %v1065_v6 = vsel %vm1062_vm7, %v1064_v3, %v1060_v5  ;;  %v2448_v41 = vsel %vm1223_vm8, %v1842_v36, %v1222_v40 }
 0x2f3   : > { %v1066_v7 = vmul.f32 %v2410_v25, %v1065_v6 }
 0x2f5   : > { %1644 = vst.msk [vmem:[%s2414_s3 + $0x10] sm:$0xff] %vm872_vm2, %v1066_v7  ;;  %v1148_v8 = vld [vmem:[#allocation3 + $0xc] sm:$0xf]  ;;  %v1069_v15 = vpack.c.bf16 %v1066_v7, %v1066_v7 }
 0x2f6   : > { %v1153_v9 = vsel %vm922_vm3, %v1148_v8, 0  ;;  %v937_v10 = vpop.f32.mrf.mxu0 }
 0x2f7   : > { %1162 = vmatpush.bf16.msra.mxu2 %v1153_v9 }
 0x2f9   : > { %v810_v12 = vpop.permute.xlu1 %809 }
 0x2fa   : > { %1648 = vmatmul.msk.bf16.vlgmr.msra.gmra.mxu2 %vm872_vm2, %v1146_v11  ;;  %813 = vst.msk [vmem:[#allocation3 + $0x8] sm:$0xf] %vm789_vm1, %v810_v12  ;;  %vm1018_vm1 = vcmask 130112   ;;  %v1704_v12 = vld [vmem:[%s2559_s14 + $0x18] sm:$0xff] }
 0x2fb   : > { %1361 = vmatpush.bf16.msrb.mxu1 %v1704_v12 }
 0x301   : > { %v1071_v13 = vld [vmem:[#allocation3 + $0x8] sm:$0xf] }
 0x302   : > { %v1076_v14 = vsel %vm922_vm3, %v1071_v13, 0  ;;  %vm1172_vm3 = vcmask 261312  }
 0x303   : > { %1085 = vmatpush.bf16.msra.mxu0 %v1076_v14 }
 0x306   : > { %1645 = vmatmul.msk.bf16.vlgmr.msra.gmra.mxu0 %vm872_vm2, %v1069_v15  ;;  %vm1095_vm2 = vcmask 195712   ;;  %v1703_v15 = vld [vmem:[%s2559_s14 + $0x10] sm:$0xff] }
 0x307   : > { %1282 = vmatpush.bf16.msrb.mxu0 %v1700_v46  ;;  %1362 = vmatpush.bf16.msrb.mxu1 %v1703_v15 }
 0x30b   : > { %1283 = vmatpush.bf16.msrb.mxu0 %v1699_v47 }
 0x362   : > { %v1010_v16 = vpop.f32.mrf.mxu2 }
 0x363   : > { %1015 = vrot.lane.b32.xlu2 %v1010_v16, %s2572_s23  ;;  %s1989_s23 = scalar_lea.hbm %s2608_s8, 64 }
 0x36a   : > { %v1012_v17 = vpop.f32.mrf.mxu2 }
 0x37d   : > { %v1164_v18 = vpop.f32.mrf.mxu2 }
 0x37e   : > { %1169 = vrot.lane.b32.xlu2 %v1164_v18, %s2102_s12  ;;  %v1702_v18 = vld [vmem:[%s2559_s14 + $0x8] sm:$0xff]  ;;  %s1437_s12 = scalar_lea.hbm %s2608_s8, %s1705_s27 }
 0x37f   : > { %1363 = vmatpush.bf16.msrb.mxu1 %v1702_v18  ;;  %s1440_s1 = sshll.u32 %s1437_s12, 4  ;;  %s1441_s1 = int_to_ptr.hbm [resolvable:$true] %s1440_s1 }
 0x380   : > { %s1983_s26 = sshra.s32 %s1441_s1, 4  ;;  %s1984_s26 = int_to_ptr.hbm [resolvable:$true] %s1983_s26 }
 0x381   : > { %s1985_s17 = scalar_lea.hbm %s1984_s26, 32  ;;  %p1990_p11 = scmp.lt.s32.totalorder %s1984_s26, %s2608_s8 }
 0x382   : > { %p1986_p1 = scmp.ne.s32.totalorder %s1984_s26, %s1985_s17  ;;  %p1991_p12 = scmp.lt.s32.totalorder %s1989_s23, %s1985_s17 }
 0x383   : > { %v1087_v19 = vpop.f32.mrf.mxu0 }
 0x384   : > { %1092 = vrot.lane.b32.xlu0 %v1087_v19, %s2103_s0  ;;  %s1438_s0 = sshll.u32 %s2414_s3, 4  ;;  %p1987_p9 = pnand %p1986_p1, %p2297_p4  ;;  %s1439_s0 = int_to_ptr.vmem [resolvable:$true] %s1438_s0 }
 0x385   : > { %v1166_v20 = vpop.f32.mrf.mxu2  ;;  %p1992_p13 = por %p1991_p12, %p1990_p11 }
 0x386   : > { %p1988_p10 = pneg %p1987_p9 }
 0x388   : > { %p1993_p0 = pnand %p1992_p13, %p1988_p10 }
 0x38b   : > { %v1089_v21 = vpop.f32.mrf.mxu0 }
 0x38c   : > { %v1701_v21 = vld [vmem:[%s2559_s14] sm:$0xff] }
 0x38d   : > { %1364 = vmatpush.bf16.msrb.mxu1 %v1701_v21 }
 0x3bd   : > { %v1016_v22 = vpop.permute.xlu2 %1015 }
 0x3be   : > { %1019 = vst.msk [vmem:[#allocation4] sm:$0xff] %vm1018_vm1, %v1016_v22 }
 0x3d8   : > { %v1170_v26 = vpop.permute.xlu2 %1169 }
 0x3f6   : > { %v1093_v25 = vpop.permute.xlu0 %1092 }
 0x3f7   : > { %1096 = vst.msk [vmem:[#allocation4] sm:$0xff] %vm1095_vm2, %v1093_v25 }
 0x3f8   : > { %1173 = vst.msk [vmem:[#allocation4] sm:$0xff] %vm1172_vm3, %v1170_v26 }
 0x3ff   : > { %v1174_v27 = vld [vmem:[#allocation4] sm:$0xff] }
 0x400   : > { %v1175_v28 = vpack.c.bf16 %v1174_v27, %v1174_v27 }
 0x402   : > { %1657 = vmatmul.msk.bf16.vlgmr.msra.gmra.mxu3 %vm737_vm0, %v1175_v28 }
 0x485   : > { %v1208_v30 = vpop.f32.mrf.mxu3 }
 0x486   : > { %v1209_v31 = vadd.f32 %v1818_v29, %v1208_v30 }
 0x488   : > { %v1212_v32 = vadd.f32 %v1209_v31, %v2352_v4 }
 0x48a   : > { %v1215_v33 = vsel %vm737_vm0, %v1212_v32, 0.0 }
 0x48b   : > { %1216 = vadd.xlane.f32.xlu1 %v1215_v33 }
 0x48d   : > { %v1210_v34 = vpop.f32.mrf.mxu3 }
 0x4fe   : > { %v1217_v42 = vpop.xlane.xlu1 %1216 }
 0x4ff   : > { %v1225_v44 = vmul.f32 %v2448_v41, %v1217_v42 }
 0x501   : > { %v1226_v43 = vsub.f32 %v1212_v32, %v1225_v44 }
 0x503   : > { %v1227_v45 = vmul.f32 %v1226_v43, %v1226_v43 }
 0x505   : > { %v1228_v4 = vsel %vm737_vm0, %v1227_v45, 0.0 }
 0x506   : > { %1229 = vadd.xlane.f32.xlu0 %v1228_v4 }
 0x579   : > { %v1230_v48 = vpop.xlane.xlu0 %1229 }
 0x57a   : > { %v1231_v49 = vmul.f32 %v1230_v48, %v2448_v41 }
 0x57c   : > { %v1232_v50 = vadd.f32 1e-12, %v1231_v49 }
 0x57e   : > { %1843 = vrsqrt.f32 %v1232_v50  ;;  %vm1239_vm10 = vweird.f32 %v1232_v50 }
 0x584   : > { %v1844_v51 = vpop.eup %1843 }
 0x585   : > { %v1234_v52 = vmul.f32 %v1844_v51, %v1232_v50  ;;  %vm1240_vm9 = vweird.f32 %v1844_v51 }
 0x586   : > { %vm1241_vm11 = vmor %vm1239_vm10, %vm1240_vm9 }
 0x587   : > { %v1235_v53 = vmul.f32 %v1844_v51, %v1234_v52 }
 0x589   : > { %v1236_v54 = vmul.f32 0.5, %v1235_v53 }
 0x58b   : > { %v1237_v55 = vsub.f32 1.5, %v1236_v54 }
 0x58d   : > { %v1238_v56 = vmul.f32 %v1844_v51, %v1237_v55 }
 0x58f   : > { %v1242_v58 = vsel %vm1241_vm11, %v1844_v51, %v1238_v56 }
 0x590   : > { %v1243_v60 = vmul.f32 %v1242_v58, %v1226_v43 }
 0x592   : > { %v1247_v61 = vmul.f32 %v1819_v57, %v1243_v60 }
 0x594   : > { %v1251_v62 = vadd.f32 %v1820_v59, %v1247_v61 }
 0x596   : > { %v1252_v63 = vpack.c.bf16 %v1251_v62, %v1251_v62 }
 0x598   : > { %1666 = vmatmul.msk.bf16.vlgmr.msrb.gmra.mxu0 %vm737_vm0, %v1252_v63 }
 0x615   : > { %v1285_v1 = vpop.f32.mrf.mxu0 }
 0x616   : > { %v1286_v2 = vadd.f32 %v1821_v0, %v1285_v1 }
 0x618   : > { %v1289_v3 = vpack.c.bf16 %v1286_v2, %v1286_v2 }
 0x61a   : > { %v1290_v5 = vunpack.c.l.bf16 %v1289_v3 }
 0x61c   : > { %v1291_v6 = vmul.f32 %v1290_v5, %v1290_v5 }
 0x61d   : > { %v1287_v7 = vpop.f32.mrf.mxu0 }
 0x61e   : > { %v1292_v8 = vpack.c.bf16 %v1291_v6, %v1291_v6 }
 0x620   : > { %v1293_v9 = vunpack.c.l.bf16 %v1292_v8 }
 0x622   : > { %v1294_v10 = vmul.f32 %v1293_v9, %v1290_v5 }
 0x624   : > { %v1295_v11 = vpack.c.bf16 %v1294_v10, %v1294_v10 }
 0x626   : > { %v1296_v13 = vunpack.c.l.bf16 %v1295_v11 }
 0x628   : > { %v1297_v14 = vmul.f32 0.044677734, %v1296_v13 }
 0x62a   : > { %v1298_v16 = vpack.c.bf16 %v1297_v14, %v1297_v14 }
 0x62c   : > { %v1299_v17 = vunpack.c.l.bf16 %v1298_v16 }
 0x62e   : > { %v1300_v19 = vadd.f32 %v1299_v17, %v1290_v5 }
 0x630   : > { %v1301_v20 = vpack.c.bf16 %v1300_v19, %v1300_v19 }
 0x632   : > { %v1302_v22 = vunpack.c.l.bf16 %v1301_v20 }
 0x634   : > { %v1303_v23 = vmul.f32 0.796875, %v1302_v22 }
 0x636   : > { %v1304_v24 = vpack.c.bf16 %v1303_v23, %v1303_v23 }
 0x638   : > { %v1305_v25 = vunpack.c.l.bf16 %v1304_v24 }
 0x63a   : > { %1845 = vtanh.f32 %v1305_v25 }
 0x640   : > { %v1846_v26 = vpop.eup %1845 }
 0x641   : > { %v1307_v27 = vpack.c.bf16 %v1846_v26, %v1846_v26 }
 0x643   : > { %v1308_v28 = vunpack.c.l.bf16 %v1307_v27 }
 0x645   : > { %v1309_v29 = vadd.f32 1.0, %v1308_v28 }
 0x647   : > { %v1310_v30 = vpack.c.bf16 %v1309_v29, %v1309_v29 }
 0x649   : > { %v1311_v31 = vunpack.c.l.bf16 %v1310_v30 }
 0x64b   : > { %v1312_v32 = vmul.f32 0.5, %v1311_v31 }
 0x64d   : > { %v1313_v33 = vpack.c.bf16 %v1312_v32, %v1312_v32 }
 0x64f   : > { %v1314_v34 = vunpack.c.l.bf16 %v1313_v33 }
 0x651   : > { %v1315_v35 = vmul.f32 %v1314_v34, %v1290_v5 }
 0x653   : > { %v1316_v36 = vpack.c.bf16 %v1315_v35, %v1315_v35 }
 0x655   : > { %1683 = vmatmul.msk.bf16.vlgmr.msrb.gmra.mxu1 %vm1353_vm12, %v1316_v36 }
 0x6d2   : > { %v1366_v38 = vpop.f32.mrf.mxu1 }
 0x6d3   : > { %v1367_v39 = vadd.f32 %v1822_v37, %v1366_v38 }
 0x6d5   : > { %v1370_v40 = vadd.f32 %v1367_v39, %v1251_v62 }
 0x6d7   : > { %v1373_v42 = vsel %vm737_vm0, %v1370_v40, 0.0 }
 0x6d8   : > { %1374 = vadd.xlane.f32.xlu2 %v1373_v42 }
 0x6da   : > { %v1368_v44 = vpop.f32.mrf.mxu1 }
 0x74b   : > { %v1375_v43 = vpop.xlane.xlu2 %1374 }
 0x74c   : > { %v1376_v45 = vmul.f32 %v1375_v43, %v2448_v41 }
 0x74e   : > { %v1377_v4 = vsub.f32 %v1370_v40, %v1376_v45 }
 0x750   : > { %v1378_v46 = vmul.f32 %v1377_v4, %v1377_v4 }
 0x752   : > { %v1379_v47 = vsel %vm737_vm0, %v1378_v46, 0.0 }
 0x753   : > { %1380 = vadd.xlane.f32.xlu1 %v1379_v47 }
 0x754   : > { %1996 = shalt.err (!%p1993_p0)
}
 0x755   : > { %s2105_s3 = smov 128   ;;  %s2609_s27 = smov 8  }
 0x756   : > { %1721 = dma.vmem_to_hbm [thread:$0]  (%p2297_p4), %s1439_s0, 512, %s1441_s1, %s1410_s2, %s2105_s3, %s2105_s3, %s2609_s27  }
 0x757   : > { %s1608_s4 = sshll.u32 %s2319_s28, 3  ;;  %s1686_s5 = sshll.u32 %s2083_s21, 3 }
 0x758   : > { %s2610_s18 = sld [smem:[#allocation34_spill]]  ;;  %s698_s21 = scalar_lea.vmem [#allocation13], %s1608_s4 }
 0x759   : > { %s2611_s1 = sld [smem:[#allocation36_spill]]  ;;  %s1423_s3 = sshll.u32 %s698_s21, 4  ;;  %s1424_s3 = int_to_ptr.vmem [resolvable:$true] %s1423_s3 }
 0x75a   : > { %s2613_s6 = sld [smem:[#allocation35_spill]]  ;;  %s1405_s23 = scalar_lea.sflag [#allocation7], %s2319_s28 }
 0x75e   : > { %v1823_v57 = vld [vmem:[%s2610_s18] ss:$0 sm:$0xff] }
 0x75f   : > { %s2612_s2 = smov %s2611_s1  ;;  %s1421_s26 = scalar_lea.hbm %s2611_s1, %s1686_s5 }
 0x760   : > { %v1824_v59 = vld [vmem:[%s2613_s6] ss:$0 sm:$0xff]  ;;  %s1425_s27 = sshll.u32 %s1421_s26, 4  ;;  %s2017_s4 = scalar_lea.hbm %s2612_s2, 16  ;;  %s1426_s27 = int_to_ptr.hbm [resolvable:$true] %s1425_s27 }
 0x761   : > { %s2011_s25 = sshra.s32 %s1426_s27, 4  ;;  %s2012_s25 = int_to_ptr.hbm [resolvable:$true] %s2011_s25 }
 0x762   : > { %s2013_s5 = scalar_lea.hbm %s2012_s25, 8  ;;  %p2018_p3 = scmp.lt.s32.totalorder %s2012_s25, %s2612_s2 }
 0x763   : > { %p2014_p2 = scmp.ne.s32.totalorder %s2012_s25, %s2013_s5  ;;  %p2019_p1 = scmp.lt.s32.totalorder %s2017_s4, %s2013_s5 }
 0x765   : > { %p2015_p5 = pnand %p2014_p2, %p2297_p4  ;;  %p2020_p9 = por %p2019_p1, %p2018_p3 }
 0x767   : > { %p2016_p8 = pneg %p2015_p5 }
 0x769   : > { %p2021_p10 = pnand %p2020_p9, %p2016_p8 }
 0x7c6   : > { %v1381_v48 = vpop.xlane.xlu1 %1380 }
 0x7c7   : > { %v1382_v49 = vmul.f32 %v1381_v48, %v2448_v41 }
 0x7c9   : > { %v1383_v50 = vadd.f32 1e-12, %v1382_v49 }
 0x7cb   : > { %1847 = vrsqrt.f32 %v1383_v50  ;;  %vm1390_vm14 = vweird.f32 %v1383_v50 }
 0x7d1   : > { %v1848_v51 = vpop.eup %1847 }
 0x7d2   : > { %v1385_v52 = vmul.f32 %v1848_v51, %v1383_v50  ;;  %vm1391_vm13 = vweird.f32 %v1848_v51 }
 0x7d3   : > { %vm1392_vm15 = vmor %vm1390_vm14, %vm1391_vm13 }
 0x7d4   : > { %v1386_v53 = vmul.f32 %v1848_v51, %v1385_v52 }
 0x7d6   : > { %v1387_v54 = vmul.f32 0.5, %v1386_v53 }
 0x7d8   : > { %v1388_v55 = vsub.f32 1.5, %v1387_v54 }
 0x7da   : > { %v1389_v56 = vmul.f32 %v1848_v51, %v1388_v55 }
 0x7dc   : > { %v1393_v41 = vsel %vm1392_vm15, %v1848_v51, %v1389_v56 }
 0x7dd   : > { %v1394_v58 = vmul.f32 %v1393_v41, %v1377_v4 }
 0x7df   : > { %v1398_v60 = vmul.f32 %v1823_v57, %v1394_v58 }
 0x7e1   : > { %v1402_v61 = vadd.f32 %v1824_v59, %v1398_v60 }
 0x7e3   : > { %1403 = vst.msk [vmem:[%s698_s21] sm:$0xff] %vm737_vm0, %v1402_v61 }
 0x7e4   : > { %2024 = shalt.err (!%p2021_p10)
}
 0x7e5   : > { %1720 = dma.vmem_to_hbm [thread:$0]  (%p2297_p4), %s1424_s3, 128, %s1426_s27, %s1405_s23  }
 0x7e6 PF: > { %s2614_s28 = sld [smem:[#allocation21_spill]]  ;;  %p1739_p11 = pnand %p1603_p6, %p2305_p7 }
 0x7e8   : > { %p1740_p12 = pneg %p1739_p11 }
 0x7ec   : > { %s1455_s26 = sand.u32 1, %s2614_s28  }
 0x7ed   : > { %s1456_s17 = scalar_lea.sflag [#allocation7], %s1455_s26 }
 0x7ee   : > { %2062 = dma.done.wait (%p1740_p12), %s1456_s17, 128  }
 0x7ef   : > { %2064 = vsyncadd (%p1740_p12), %s1456_s17, 4294967168  ;;  %s1466_s16 = scalar_lea.sflag [#allocation15], %s1455_s26 }
 0x7f0   : > { %2066 = dma.done.wait (%p1740_p12), %s1466_s16, 512  }
 0x7f1   : > { %2068 = vsyncadd (%p1740_p12), %s1466_s16, 4294966784  ;;  %s41_s22 = sadd.s32 1, %s2091_s22   ;;  %s2615_s19 = sld [smem:[#allocation24_spill]] }
 0x7f2   : > { %p38_p13 = scmp.ge.s32.totalorder %s41_s22, 4   ;;  %s2616_s21 = sld [smem:[#allocation22_spill]] }
 0x7f3   : > { %s2617_s1 = sld [smem:[#allocation23_spill]]  ;;  %s2618_s0 = smov %s2075_s30 }
 0x7f4   : > { %s2619_s30 = smov %s2079_s20  ;;  %40 = sbr.rel (!%p38_p13) target bundleno = 24 (0x18), region = 189 }
 0x7f7   : > { %s2620_s20 = smov %s2615_s19 }
 0x7f9   :  { %1472 = vsyncpa [#allocation6], 1 }
 0x7fa   :  { %1474 = vsyncpa [#allocation6 + $0x1], 1 }
 0x7fb   :  { %1475 = vsyncpa [#allocation9], 1 }
 0x7fc   :  { %1476 = vsyncpa [#allocation12], 1 }
 0x7fd   :  { %1477 = vsyncpa [#allocation7], 1 }
 0x7fe   :  { %1479 = vsyncpa [#allocation7 + $0x1], 1 }
 0x7ff   :  { %1480 = vsyncpa [#allocation15], 1 }
 0x800   :  { %1482 = vsyncpa [#allocation15 + $0x1], 1 }

</bundles_post_ra>
